<compile_context>
chip_gen: v7x
topology: tpu7x:2x2x1
jax: 0.10.0
libtpu: 0.0.40
codegen_flags: <defaults>
</compile_context>

<pallas_src>
import functools

import jax
import jax.numpy as jnp
from jax.experimental import pallas as pl
from jax.experimental.pallas import tpu as pltpu

# MXU operand dtype.  jnp.bfloat16 is recommended on v6e/v7x (~2x MXU rate,
# half the operand footprint); keep jnp.float32 for bit-accurate parity / v5e.
_MXU_DTYPE = jnp.float32
_EPS = 1e-5


# ----------------------------------------------------------------------------
# in-kernel helpers / kernels
# ----------------------------------------------------------------------------
def _conv_im2col(src_ref, w_ref, cols_ref, wp):
    """3x3 conv (already folded with its adjacent 1x1 conv) as ONE matmul.

    src_ref : (C, P) zero-padded, W-flattened activations (halo ring is zero),
              P = (H+2)*(W+2), row pitch wp = W+2.
    w_ref   : (Co, 9*C) effective weights, rows ordered tap-major, channel-minor.
    cols_ref: (9*C, Ls) VMEM scratch for the im2col matrix, Ls = H*wp - 2.
    Returns (Co, Ls) float32; slab position q corresponds to pixel (h, w) via
    q = h*wp + w (the 2 junk columns per row are masked by the caller).
    """
    n_ch = src_ref.shape[0]
    ls = cols_ref.shape[1]
    for kh in range(3):
        for kw in range(3):
            t = kh * 3 + kw
            cols_ref[pl.ds(t * n_ch, n_ch), :] = src_ref[:, pl.ds(kh * wp + kw, ls)]
    return jax.lax.dot_general(
        w_ref[...].astype(_MXU_DTYPE), cols_ref[...].astype(_MXU_DTYPE),
        dimension_numbers=(((1,), (0,)), ((), ())),
        preferred_element_type=jnp.float32)


def _stage1_kernel(x_ref, w1_ref, ms_ref, y_ref, s_ref, q_ref, cols_ref, *, wp):
    # x_ref: (C, P) padded-flat input (one batch element); w1_ref: (C, 9C)
    # y_ref: (C, P) pre-BN1 activation (padded-flat); s_ref/q_ref: (C, 1) partials
    ls = cols_ref.shape[1]
    y = _conv_im2col(x_ref, w1_ref, cols_ref, wp)           # dw3x3 + pw1x1 fused
    ym = y * ms_ref[...]                                    # zero junk pad columns
    s_ref[...] = jnp.sum(ym, axis=1, keepdims=True)         # BN1 partial sum
    q_ref[...] = jnp.sum(ym * y, axis=1, keepdims=True)     # BN1 partial sum of squares
    y_ref[...] = jnp.zeros_like(y_ref)                      # keep halo ring at zero
    y_ref[:, pl.ds(wp + 1, ls)] = ym                        # write interior slab


def _stage2_kernel(y_ref, sc1_ref, bi1_ref, w2_ref, mf_ref, ms_ref,
                   z_ref, s_ref, q_ref, a_ref, cols_ref, *, wp):
    # y_ref: (C, P); sc1/bi1: (C, 1); w2_ref: (Cout, 9C); mf: (1, P); ms: (1, Ls)
    # z_ref: (Cout, Ls) pre-BN2; s/q: (Cout, 1); a_ref: (C, P) scratch
    a = jnp.maximum(y_ref[...] * sc1_ref[...] + bi1_ref[...], 0.0) * mf_ref[...]
    a_ref[...] = a                                          # BN1 + ReLU (masked halo)
    z = _conv_im2col(a_ref, w2_ref, cols_ref, wp)           # conv3x3 + pw1x1 fused
    zm = z * ms_ref[...]
    s_ref[...] = jnp.sum(zm, axis=1, keepdims=True)         # BN2 partial stats
    q_ref[...] = jnp.sum(zm * z, axis=1, keepdims=True)
    z_ref[...] = z


def _stage3_kernel(z_ref, sc2_ref, bi2_ref, o_ref):
    # BN2 + ReLU (lane-dense elementwise)
    o_ref[...] = jnp.maximum(z_ref[...] * sc2_ref[...] + bi2_ref[...], 0.0)


# ----------------------------------------------------------------------------
# wrapper
# ----------------------------------------------------------------------------
def adapter_forward(x_nchw, params):
    """x_nchw: (N, C, H, W) float32 -> (N, Cout, H, W) float32 (training-mode BN)."""
    n, c, h, w = x_nchw.shape
    cout = params["w_pw2"].shape[0]
    wp = w + 2                       # padded row pitch
    p_len = (h + 2) * wp             # padded-flat length per channel
    ls = h * wp - 2                  # output slab length (covers every interior pixel)
    cnt = n * h * w
    f32 = jnp.float32

    # -- fold (depthwise3x3, pw1x1) and (conv3x3, pw1x1) into single 3x3 convs (exact)
    w1 = jnp.einsum("oc,ckl->ockl", params["w_pw1"][:, :, 0, 0],
                    params["w_dw"][:, 0])                        # (C, C, 3, 3)
    w1_mat = jnp.transpose(w1, (0, 2, 3, 1)).reshape(c, 9 * c)   # row = tap*C + cin
    w2 = jnp.einsum("om,mckl->ockl", params["w_pw2"][:, :, 0, 0],
                    params["w_c3"])                              # (Cout, C, 3, 3)
    w2_mat = jnp.transpose(w2, (0, 2, 3, 1)).reshape(cout, 9 * c)

    # -- zero-padded, W-flattened (lane-dense) input + validity masks
    x_flat = jnp.pad(x_nchw, ((0, 0), (0, 0), (1, 1), (1, 1))).reshape(n, c, p_len)
    q_idx = jnp.arange(ls, dtype=jnp.int32)
    mask_slab = ((q_idx % wp) < w).astype(f32)[None, :]          # (1, Ls)
    o_idx = jnp.arange(p_len, dtype=jnp.int32)
    row, col = o_idx // wp, o_idx % wp
    mask_full = ((row >= 1) & (row <= h) &
                 (col >= 1) & (col <= w)).astype(f32)[None, :]   # (1, P)

    par = pltpu.CompilerParams(dimension_semantics=("parallel",))

    def batch_spec(shape):
        nd = len(shape)
        return pl.BlockSpec((None,) + shape, lambda i, _nd=nd: (i,) + (0,) * _nd)

    def full_spec(shape):
        nd = len(shape)
        return pl.BlockSpec(shape, lambda i, _nd=nd: (0,) * _nd)

    # ---- stage 1: fused dw3x3+pw1x1 (one K=9C matmul) + BN1 partial stats ----
    y_pre, s1, q1 = pl.pallas_call(
        functools.partial(_stage1_kernel, wp=wp),
        grid=(n,),
        in_specs=[batch_spec((c, p_len)), full_spec((c, 9 * c)), full_spec((1, ls))],
        out_specs=(batch_spec((c, p_len)), batch_spec((c, 1)), batch_spec((c, 1))),
        out_shape=(jax.ShapeDtypeStruct((n, c, p_len), f32),
                   jax.ShapeDtypeStruct((n, c, 1), f32),
                   jax.ShapeDtypeStruct((n, c, 1), f32)),
        scratch_shapes=[pltpu.VMEM((9 * c, ls), f32)],
        compiler_params=par,
        cost_estimate=pl.CostEstimate(flops=2 * n * c * 9 * c * ls,
                                      transcendentals=0,
                                      bytes_accessed=4 * n * c * 2 * p_len),
    )(x_flat, w1_mat, mask_slab)

    # BN1: fold batch statistics into per-channel scale/bias (tiny O(C) math)
    mean1 = jnp.sum(s1, axis=0) / cnt                            # (C, 1)
    var1 = jnp.maximum(jnp.sum(q1, axis=0) / cnt - mean1 * mean1, 0.0)
    scale1 = params["g1"].reshape(c, 1) * jax.lax.rsqrt(var1 + _EPS)
    bias1 = params["b1"].reshape(c, 1) - mean1 * scale1

    # ---- stage 2: BN1+ReLU, fused conv3x3+pw1x1 + BN2 partial stats ----------
    z_pre, s2, q2 = pl.pallas_call(
        functools.partial(_stage2_kernel, wp=wp),
        grid=(n,),
        in_specs=[batch_spec((c, p_len)), full_spec((c, 1)), full_spec((c, 1)),
                  full_spec((cout, 9 * c)), full_spec((1, p_len)), full_spec((1, ls))],
        out_specs=(batch_spec((cout, ls)), batch_spec((cout, 1)), batch_spec((cout, 1))),
        out_shape=(jax.ShapeDtypeStruct((n, cout, ls), f32),
                   jax.ShapeDtypeStruct((n, cout, 1), f32),
                   jax.ShapeDtypeStruct((n, cout, 1), f32)),
        scratch_shapes=[pltpu.VMEM((c, p_len), f32), pltpu.VMEM((9 * c, ls), f32)],
        compiler_params=par,
        cost_estimate=pl.CostEstimate(flops=2 * n * cout * 9 * c * ls + 4 * n * c * p_len,
                                      transcendentals=0,
                                      bytes_accessed=4 * n * (c * p_len + cout * ls)),
    )(y_pre, scale1, bias1, w2_mat, mask_full, mask_slab)

    mean2 = jnp.sum(s2, axis=0) / cnt                            # (Cout, 1)
    var2 = jnp.maximum(jnp.sum(q2, axis=0) / cnt - mean2 * mean2, 0.0)
    scale2 = params["g2"].reshape(cout, 1) * jax.lax.rsqrt(var2 + _EPS)
    bias2 = params["b2"].reshape(cout, 1) - mean2 * scale2

    # ---- stage 3: BN2 + ReLU --------------------------------------------------
    out_slab = pl.pallas_call(
        _stage3_kernel,
        grid=(n,),
        in_specs=[batch_spec((cout, ls)), full_spec((cout, 1)), full_spec((cout, 1))],
        out_specs=batch_spec((cout, ls)),
        out_shape=jax.ShapeDtypeStruct((n, cout, ls), f32),
        compiler_params=par,
        cost_estimate=pl.CostEstimate(flops=2 * n * cout * ls, transcendentals=0,
                                      bytes_accessed=8 * n * cout * ls),
    )(z_pre, scale2, bias2)

    # unflatten: slab position q = h*(W+2) + w  ->  pixel (h, w); drop junk cols
    out_full = jnp.pad(out_slab, ((0, 0), (0, 0), (0, h * wp - ls)))
    return out_full.reshape(n, cout, h, wp)[:, :, :, :w]


# ----------------------------------------------------------------------------
# params / reference / main
# ----------------------------------------------------------------------------
def init_params(key, channel_in, channel_out):
    ks = jax.random.split(key, 6)
    return {
        # PyTorch weight layouts, built deterministically in-script
        "w_dw":  0.1 * jax.random.normal(ks[0], (channel_in, 1, 3, 3), jnp.float32),
        "w_pw1": 0.1 * jax.random.normal(ks[1], (channel_in, channel_in, 1, 1), jnp.float32),
        "g1":    1.0 + 0.1 * jax.random.normal(ks[2], (channel_in,), jnp.float32),
        "b1":    0.1 * jax.random.normal(ks[3], (channel_in,), jnp.float32),
        "w_c3":  0.1 * jax.random.normal(ks[4], (channel_in, channel_in, 3, 3), jnp.float32),
        "w_pw2": 0.1 * jax.random.normal(ks[5], (channel_out, channel_in, 1, 1), jnp.float32),
        "g2":    jnp.ones((channel_out,), jnp.float32),
        "b2":    jnp.zeros((channel_out,), jnp.float32),
    }


def adapter_reference(x, prm):
    """Plain-JAX reference of the PyTorch module (training-mode BN)."""
    dn = ("NCHW", "OIHW", "NCHW")
    hp = jax.lax.Precision.HIGHEST

    def bn(a, g, b):
        m = jnp.mean(a, axis=(0, 2, 3), keepdims=True)
        v = jnp.mean((a - m) ** 2, axis=(0, 2, 3), keepdims=True)
        return ((a - m) * jax.lax.rsqrt(v + _EPS) * g.reshape(1, -1, 1, 1)
                + b.reshape(1, -1, 1, 1))

    y = jax.lax.conv_general_dilated(x, prm["w_dw"], (1, 1), ((1, 1), (1, 1)),
                                     dimension_numbers=dn,
                                     feature_group_count=x.shape[1], precision=hp)
    y = jax.lax.conv_general_dilated(y, prm["w_pw1"], (1, 1), ((0, 0), (0, 0)),
                                     dimension_numbers=dn, precision=hp)
    y = jnp.maximum(bn(y, prm["g1"], prm["b1"]), 0.0)
    z = jax.lax.conv_general_dilated(y, prm["w_c3"], (1, 1), ((1, 1), (1, 1)),
                                     dimension_numbers=dn, precision=hp)
    z = jax.lax.conv_general_dilated(z, prm["w_pw2"], (1, 1), ((0, 0), (0, 0)),
                                     dimension_numbers=dn, precision=hp)
    return jnp.maximum(bn(z, prm["g2"], prm["b2"]), 0.0)


if __name__ == "__main__":
    key = jax.random.PRNGKey(0)
    k_x, k_p = jax.random.split(key)

    N, C_IN, C_OUT, H, W = 2, 4, 8, 16, 16
    x = jax.random.normal(k_x, (N, C_IN, H, W), jnp.float32)
    params = init_params(k_p, C_IN, C_OUT)

    fwd = jax.jit(adapter_forward)
    out = jax.block_until_ready(fwd(x, params))
    assert out.shape == (N, C_OUT, H, W)

    ref = jax.block_until_ready(adapter_reference(x, params))
    max_err = float(jnp.max(jnp.abs(out - ref)))
    assert max_err < 5e-2, f"max abs error vs reference: {max_err}"
    print("KERNEL_OK")
</pallas_src>

<mosaic_0001>
module attributes {stable_mosaic.version = 11 : i64} {
  func.func @_stage1_kernel(%arg0: i32, %arg1: memref<1x4x324xf32, #tpu.memory_space<vmem>>, %arg2: memref<4x36xf32, #tpu.memory_space<vmem>>, %arg3: memref<1x286xf32, #tpu.memory_space<vmem>>, %arg4: memref<1x4x324xf32, #tpu.memory_space<vmem>>, %arg5: memref<1x4x1xf32, #tpu.memory_space<vmem>>, %arg6: memref<1x4x1xf32, #tpu.memory_space<vmem>>, %arg7: memref<36x286xf32, #tpu.memory_space<vmem>>) attributes {dimension_semantics = [#tpu.dimension_semantics<parallel>], iteration_bounds = array<i64: 2>, scalar_prefetch = 0 : i64, scratch_operands = 1 : i64, tpu.core_type = #tpu.core_type<tc>, window_params = [{transform_indices = @transform_0, window_bounds = array<i64: 1, 4, 324>}, {pipeline_mode = #tpu.pipeline_mode<synchronous>, transform_indices = @transform_1, window_bounds = array<i64: 4, 36>}, {pipeline_mode = #tpu.pipeline_mode<synchronous>, transform_indices = @transform_2, window_bounds = array<i64: 1, 286>}, {transform_indices = @transform_3, window_bounds = array<i64: 1, 4, 324>}, {transform_indices = @transform_4, window_bounds = array<i64: 1, 4, 1>}, {transform_indices = @transform_5, window_bounds = array<i64: 1, 4, 1>}]} {
    %c0 = arith.constant 0 : index
    %c0_0 = arith.constant 0 : index
    %c0_1 = arith.constant 0 : index
    %0 = vector.load %arg1[%c0, %c0_0, %c0_1] : memref<1x4x324xf32, #tpu.memory_space<vmem>>, vector<1x4x286xf32>
    %1 = vector.shape_cast %0 : vector<1x4x286xf32> to vector<4x286xf32>
    %c0_2 = arith.constant 0 : index
    %c0_3 = arith.constant 0 : index
    %2 = vector.load %arg7[%c0_2, %c0_3] : memref<36x286xf32, #tpu.memory_space<vmem>>, vector<4x286xf32>
    tpu.vector_store %arg7[%c0_2, %c0_3], %1 {strides = array<i32>} : memref<36x286xf32, #tpu.memory_space<vmem>>, vector<4x286xf32>,
    %c0_4 = arith.constant 0 : index
    %c0_5 = arith.constant 0 : index
    %c1 = arith.constant 1 : index
    %3 = vector.load %arg1[%c0_4, %c0_5, %c1] : memref<1x4x324xf32, #tpu.memory_space<vmem>>, vector<1x4x286xf32>
    %4 = vector.shape_cast %3 : vector<1x4x286xf32> to vector<4x286xf32>
    %c4 = arith.constant 4 : index
    %c0_6 = arith.constant 0 : index
    %5 = vector.load %arg7[%c4, %c0_6] : memref<36x286xf32, #tpu.memory_space<vmem>>, vector<4x286xf32>
    tpu.vector_store %arg7[%c4, %c0_6], %4 {strides = array<i32>} : memref<36x286xf32, #tpu.memory_space<vmem>>, vector<4x286xf32>,
    %c0_7 = arith.constant 0 : index
    %c0_8 = arith.constant 0 : index
    %c2 = arith.constant 2 : index
    %6 = vector.load %arg1[%c0_7, %c0_8, %c2] : memref<1x4x324xf32, #tpu.memory_space<vmem>>, vector<1x4x286xf32>
    %7 = vector.shape_cast %6 : vector<1x4x286xf32> to vector<4x286xf32>
    %c8 = arith.constant 8 : index
    %c0_9 = arith.constant 0 : index
    %8 = vector.load %arg7[%c8, %c0_9] : memref<36x286xf32, #tpu.memory_space<vmem>>, vector<4x286xf32>
    tpu.vector_store %arg7[%c8, %c0_9], %7 {strides = array<i32>} : memref<36x286xf32, #tpu.memory_space<vmem>>, vector<4x286xf32>,
    %c0_10 = arith.constant 0 : index
    %c0_11 = arith.constant 0 : index
    %c18 = arith.constant 18 : index
    %9 = vector.load %arg1[%c0_10, %c0_11, %c18] : memref<1x4x324xf32, #tpu.memory_space<vmem>>, vector<1x4x286xf32>
    %10 = vector.shape_cast %9 : vector<1x4x286xf32> to vector<4x286xf32>
    %c12 = arith.constant 12 : index
    %c0_12 = arith.constant 0 : index
    %11 = vector.load %arg7[%c12, %c0_12] : memref<36x286xf32, #tpu.memory_space<vmem>>, vector<4x286xf32>
    tpu.vector_store %arg7[%c12, %c0_12], %10 {strides = array<i32>} : memref<36x286xf32, #tpu.memory_space<vmem>>, vector<4x286xf32>,
    %c0_13 = arith.constant 0 : index
    %c0_14 = arith.constant 0 : index
    %c19 = arith.constant 19 : index
    %12 = vector.load %arg1[%c0_13, %c0_14, %c19] : memref<1x4x324xf32, #tpu.memory_space<vmem>>, vector<1x4x286xf32>
    %13 = vector.shape_cast %12 : vector<1x4x286xf32> to vector<4x286xf32>
    %c16 = arith.constant 16 : index
    %c0_15 = arith.constant 0 : index
    %14 = vector.load %arg7[%c16, %c0_15] : memref<36x286xf32, #tpu.memory_space<vmem>>, vector<4x286xf32>
    tpu.vector_store %arg7[%c16, %c0_15], %13 {strides = array<i32>} : memref<36x286xf32, #tpu.memory_space<vmem>>, vector<4x286xf32>,
    %c0_16 = arith.constant 0 : index
    %c0_17 = arith.constant 0 : index
    %c20 = arith.constant 20 : index
    %15 = vector.load %arg1[%c0_16, %c0_17, %c20] : memref<1x4x324xf32, #tpu.memory_space<vmem>>, vector<1x4x286xf32>
    %16 = vector.shape_cast %15 : vector<1x4x286xf32> to vector<4x286xf32>
    %c20_18 = arith.constant 20 : index
    %c0_19 = arith.constant 0 : index
    %17 = vector.load %arg7[%c20_18, %c0_19] : memref<36x286xf32, #tpu.memory_space<vmem>>, vector<4x286xf32>
    tpu.vector_store %arg7[%c20_18, %c0_19], %16 {strides = array<i32>} : memref<36x286xf32, #tpu.memory_space<vmem>>, vector<4x286xf32>,
    %c0_20 = arith.constant 0 : index
    %c0_21 = arith.constant 0 : index
    %c36 = arith.constant 36 : index
    %18 = vector.load %arg1[%c0_20, %c0_21, %c36] : memref<1x4x324xf32, #tpu.memory_space<vmem>>, vector<1x4x286xf32>
    %19 = vector.shape_cast %18 : vector<1x4x286xf32> to vector<4x286xf32>
    %c24 = arith.constant 24 : index
    %c0_22 = arith.constant 0 : index
    %20 = vector.load %arg7[%c24, %c0_22] : memref<36x286xf32, #tpu.memory_space<vmem>>, vector<4x286xf32>
    tpu.vector_store %arg7[%c24, %c0_22], %19 {strides = array<i32>} : memref<36x286xf32, #tpu.memory_space<vmem>>, vector<4x286xf32>,
    %c0_23 = arith.constant 0 : index
    %c0_24 = arith.constant 0 : index
    %c37 = arith.constant 37 : index
    %21 = vector.load %arg1[%c0_23, %c0_24, %c37] : memref<1x4x324xf32, #tpu.memory_space<vmem>>, vector<1x4x286xf32>
    %22 = vector.shape_cast %21 : vector<1x4x286xf32> to vector<4x286xf32>
    %c28 = arith.constant 28 : index
    %c0_25 = arith.constant 0 : index
    %23 = vector.load %arg7[%c28, %c0_25] : memref<36x286xf32, #tpu.memory_space<vmem>>, vector<4x286xf32>
    tpu.vector_store %arg7[%c28, %c0_25], %22 {strides = array<i32>} : memref<36x286xf32, #tpu.memory_space<vmem>>, vector<4x286xf32>,
    %c0_26 = arith.constant 0 : index
    %c0_27 = arith.constant 0 : index
    %c38 = arith.constant 38 : index
    %24 = vector.load %arg1[%c0_26, %c0_27, %c38] : memref<1x4x324xf32, #tpu.memory_space<vmem>>, vector<1x4x286xf32>
    %25 = vector.shape_cast %24 : vector<1x4x286xf32> to vector<4x286xf32>
    %c32 = arith.constant 32 : index
    %c0_28 = arith.constant 0 : index
    %26 = vector.load %arg7[%c32, %c0_28] : memref<36x286xf32, #tpu.memory_space<vmem>>, vector<4x286xf32>
    tpu.vector_store %arg7[%c32, %c0_28], %25 {strides = array<i32>} : memref<36x286xf32, #tpu.memory_space<vmem>>, vector<4x286xf32>,
    %c0_29 = arith.constant 0 : index
    %c0_30 = arith.constant 0 : index
    %27 = vector.load %arg2[%c0_29, %c0_30] : memref<4x36xf32, #tpu.memory_space<vmem>>, vector<4x36xf32>
    %c0_31 = arith.constant 0 : index
    %c0_32 = arith.constant 0 : index
    %28 = vector.load %arg7[%c0_31, %c0_32] : memref<36x286xf32, #tpu.memory_space<vmem>>, vector<36x286xf32>
    %cst = arith.constant dense<0.000000e+00> : vector<4x286xf32>
    %29 = tpu.matmul %27, %28, %cst {dimension_numbers = #tpu.dot_dimension_numbers<[1], [0], [0], [1], [0, 0, 1, 1], [], []>} : vector<4x36xf32>, vector<36x286xf32>, vector<4x286xf32> -> vector<4x286xf32>
    %c0_33 = arith.constant 0 : index
    %c0_34 = arith.constant 0 : index
    %30 = vector.load %arg3[%c0_33, %c0_34] : memref<1x286xf32, #tpu.memory_space<vmem>>, vector<1x286xf32>
    %31 = vector.broadcast %30 : vector<1x286xf32> to vector<4x286xf32>
    %32 = arith.mulf %29, %31 : vector<4x286xf32>
    %cst_35 = arith.constant dense<0.000000e+00> : vector<4xf32>
    %33 = vector.multi_reduction <add>, %32, %cst_35 [1] : vector<4x286xf32> to vector<4xf32>
    %34 = vector.shape_cast %33 : vector<4xf32> to vector<4x1xf32>
    %c0_36 = arith.constant 0 : index
    %c0_37 = arith.constant 0 : index
    %c0_38 = arith.constant 0 : index
    %35 = vector.load %arg5[%c0_36, %c0_37, %c0_38] : memref<1x4x1xf32, #tpu.memory_space<vmem>>, vector<1x4x1xf32>
    %36 = vector.shape_cast %35 : vector<1x4x1xf32> to vector<4x1xf32>
    %37 = vector.shape_cast %34 : vector<4x1xf32> to vector<1x4x1xf32>
    tpu.vector_store %arg5[%c0_36, %c0_37, %c0_38], %37 {strides = array<i32>} : memref<1x4x1xf32, #tpu.memory_space<vmem>>, vector<1x4x1xf32>,
    %38 = arith.mulf %32, %29 : vector<4x286xf32>
    %cst_39 = arith.constant dense<0.000000e+00> : vector<4xf32>
    %39 = vector.multi_reduction <add>, %38, %cst_39 [1] : vector<4x286xf32> to vector<4xf32>
    %40 = vector.shape_cast %39 : vector<4xf32> to vector<4x1xf32>
    %c0_40 = arith.constant 0 : index
    %c0_41 = arith.constant 0 : index
    %c0_42 = arith.constant 0 : index
    %41 = vector.load %arg6[%c0_40, %c0_41, %c0_42] : memref<1x4x1xf32, #tpu.memory_space<vmem>>, vector<1x4x1xf32>
    %42 = vector.shape_cast %41 : vector<1x4x1xf32> to vector<4x1xf32>
    %43 = vector.shape_cast %40 : vector<4x1xf32> to vector<1x4x1xf32>
    tpu.vector_store %arg6[%c0_40, %c0_41, %c0_42], %43 {strides = array<i32>} : memref<1x4x1xf32, #tpu.memory_space<vmem>>, vector<1x4x1xf32>,
    %cst_43 = arith.constant 0.000000e+00 : f32
    %44 = vector.broadcast %cst_43 : f32 to vector<4x324xf32>
    %c0_44 = arith.constant 0 : index
    %c0_45 = arith.constant 0 : index
    %c0_46 = arith.constant 0 : index
    %45 = vector.load %arg4[%c0_44, %c0_45, %c0_46] : memref<1x4x324xf32, #tpu.memory_space<vmem>>, vector<1x4x324xf32>
    %46 = vector.shape_cast %45 : vector<1x4x324xf32> to vector<4x324xf32>
    %47 = vector.shape_cast %44 : vector<4x324xf32> to vector<1x4x324xf32>
    tpu.vector_store %arg4[%c0_44, %c0_45, %c0_46], %47 {strides = array<i32>} : memref<1x4x324xf32, #tpu.memory_space<vmem>>, vector<1x4x324xf32>,
    %c0_47 = arith.constant 0 : index
    %c0_48 = arith.constant 0 : index
    %c19_49 = arith.constant 19 : index
    %48 = vector.load %arg4[%c0_47, %c0_48, %c19_49] : memref<1x4x324xf32, #tpu.memory_space<vmem>>, vector<1x4x286xf32>
    %49 = vector.shape_cast %48 : vector<1x4x286xf32> to vector<4x286xf32>
    %50 = vector.shape_cast %32 : vector<4x286xf32> to vector<1x4x286xf32>
    tpu.vector_store %arg4[%c0_47, %c0_48, %c19_49], %50 {strides = array<i32>} : memref<1x4x324xf32, #tpu.memory_space<vmem>>, vector<1x4x286xf32>,
    return
  }
  func.func @transform_0(%arg0: i32) -> (i32, i32, i32) {
    %c0_i32 = arith.constant 0 : i32
    %c0_i32_0 = arith.constant 0 : i32
    %c0_i32_1 = arith.constant 0 : i32
    return %arg0, %c0_i32, %c0_i32_0 : i32, i32, i32
  }
  func.func @transform_1(%arg0: i32) -> (i32, i32) {
    %c0_i32 = arith.constant 0 : i32
    %c0_i32_0 = arith.constant 0 : i32
    %c0_i32_1 = arith.constant 0 : i32
    return %c0_i32, %c0_i32_0 : i32, i32
  }
  func.func @transform_2(%arg0: i32) -> (i32, i32) {
    %c0_i32 = arith.constant 0 : i32
    %c0_i32_0 = arith.constant 0 : i32
    %c0_i32_1 = arith.constant 0 : i32
    return %c0_i32, %c0_i32_0 : i32, i32
  }
  func.func @transform_3(%arg0: i32) -> (i32, i32, i32) {
    %c0_i32 = arith.constant 0 : i32
    %c0_i32_0 = arith.constant 0 : i32
    %c0_i32_1 = arith.constant 0 : i32
    return %arg0, %c0_i32, %c0_i32_0 : i32, i32, i32
  }
  func.func @transform_4(%arg0: i32) -> (i32, i32, i32) {
    %c0_i32 = arith.constant 0 : i32
    %c0_i32_0 = arith.constant 0 : i32
    %c0_i32_1 = arith.constant 0 : i32
    return %arg0, %c0_i32, %c0_i32_0 : i32, i32, i32
  }
  func.func @transform_5(%arg0: i32) -> (i32, i32, i32) {
    %c0_i32 = arith.constant 0 : i32
    %c0_i32_0 = arith.constant 0 : i32
    %c0_i32_1 = arith.constant 0 : i32
    return %arg0, %c0_i32, %c0_i32_0 : i32, i32, i32
  }
}

module attributes {stable_mosaic.version = 11 : i64} {
  func.func @_stage2_kernel(%arg0: i32, %arg1: memref<1x4x324xf32, #tpu.memory_space<vmem>>, %arg2: memref<4x1xf32, #tpu.memory_space<vmem>>, %arg3: memref<4x1xf32, #tpu.memory_space<vmem>>, %arg4: memref<8x36xf32, #tpu.memory_space<vmem>>, %arg5: memref<1x324xf32, #tpu.memory_space<vmem>>, %arg6: memref<1x286xf32, #tpu.memory_space<vmem>>, %arg7: memref<1x8x286xf32, #tpu.memory_space<vmem>>, %arg8: memref<1x8x1xf32, #tpu.memory_space<vmem>>, %arg9: memref<1x8x1xf32, #tpu.memory_space<vmem>>, %arg10: memref<4x324xf32, #tpu.memory_space<vmem>>, %arg11: memref<36x286xf32, #tpu.memory_space<vmem>>) attributes {dimension_semantics = [#tpu.dimension_semantics<parallel>], iteration_bounds = array<i64: 2>, scalar_prefetch = 0 : i64, scratch_operands = 2 : i64, tpu.core_type = #tpu.core_type<tc>, window_params = [{transform_indices = @transform_0, window_bounds = array<i64: 1, 4, 324>}, {pipeline_mode = #tpu.pipeline_mode<synchronous>, transform_indices = @transform_1, window_bounds = array<i64: 4, 1>}, {pipeline_mode = #tpu.pipeline_mode<synchronous>, transform_indices = @transform_2, window_bounds = array<i64: 4, 1>}, {pipeline_mode = #tpu.pipeline_mode<synchronous>, transform_indices = @transform_3, window_bounds = array<i64: 8, 36>}, {pipeline_mode = #tpu.pipeline_mode<synchronous>, transform_indices = @transform_4, window_bounds = array<i64: 1, 324>}, {pipeline_mode = #tpu.pipeline_mode<synchronous>, transform_indices = @transform_5, window_bounds = array<i64: 1, 286>}, {transform_indices = @transform_6, window_bounds = array<i64: 1, 8, 286>}, {transform_indices = @transform_7, window_bounds = array<i64: 1, 8, 1>}, {transform_indices = @transform_8, window_bounds = array<i64: 1, 8, 1>}]} {
    %c0 = arith.constant 0 : index
    %c0_0 = arith.constant 0 : index
    %c0_1 = arith.constant 0 : index
    %0 = vector.load %arg1[%c0, %c0_0, %c0_1] : memref<1x4x324xf32, #tpu.memory_space<vmem>>, vector<1x4x324xf32>
    %1 = vector.shape_cast %0 : vector<1x4x324xf32> to vector<4x324xf32>
    %c0_2 = arith.constant 0 : index
    %c0_3 = arith.constant 0 : index
    %2 = vector.load %arg2[%c0_2, %c0_3] : memref<4x1xf32, #tpu.memory_space<vmem>>, vector<4x1xf32>
    %3 = vector.broadcast %2 : vector<4x1xf32> to vector<4x324xf32>
    %4 = arith.mulf %1, %3 : vector<4x324xf32>
    %c0_4 = arith.constant 0 : index
    %c0_5 = arith.constant 0 : index
    %5 = vector.load %arg3[%c0_4, %c0_5] : memref<4x1xf32, #tpu.memory_space<vmem>>, vector<4x1xf32>
    %6 = vector.broadcast %5 : vector<4x1xf32> to vector<4x324xf32>
    %7 = arith.addf %4, %6 : vector<4x324xf32>
    %cst = arith.constant 0.000000e+00 : f32
    %8 = vector.broadcast %cst : f32 to vector<4x324xf32>
    %9 = arith.maximumf %7, %8 : vector<4x324xf32>
    %c0_6 = arith.constant 0 : index
    %c0_7 = arith.constant 0 : index
    %10 = vector.load %arg5[%c0_6, %c0_7] : memref<1x324xf32, #tpu.memory_space<vmem>>, vector<1x324xf32>
    %11 = vector.broadcast %10 : vector<1x324xf32> to vector<4x324xf32>
    %12 = arith.mulf %9, %11 : vector<4x324xf32>
    %c0_8 = arith.constant 0 : index
    %c0_9 = arith.constant 0 : index
    %13 = vector.load %arg10[%c0_8, %c0_9] : memref<4x324xf32, #tpu.memory_space<vmem>>, vector<4x324xf32>
    tpu.vector_store %arg10[%c0_8, %c0_9], %12 {strides = array<i32>} : memref<4x324xf32, #tpu.memory_space<vmem>>, vector<4x324xf32>,
    %c0_10 = arith.constant 0 : index
    %c0_11 = arith.constant 0 : index
    %14 = vector.load %arg10[%c0_10, %c0_11] : memref<4x324xf32, #tpu.memory_space<vmem>>, vector<4x286xf32>
    %c0_12 = arith.constant 0 : index
    %c0_13 = arith.constant 0 : index
    %15 = vector.load %arg11[%c0_12, %c0_13] : memref<36x286xf32, #tpu.memory_space<vmem>>, vector<4x286xf32>
    tpu.vector_store %arg11[%c0_12, %c0_13], %14 {strides = array<i32>} : memref<36x286xf32, #tpu.memory_space<vmem>>, vector<4x286xf32>,
    %c0_14 = arith.constant 0 : index
    %c1 = arith.constant 1 : index
    %16 = vector.load %arg10[%c0_14, %c1] : memref<4x324xf32, #tpu.memory_space<vmem>>, vector<4x286xf32>
    %c4 = arith.constant 4 : index
    %c0_15 = arith.constant 0 : index
    %17 = vector.load %arg11[%c4, %c0_15] : memref<36x286xf32, #tpu.memory_space<vmem>>, vector<4x286xf32>
    tpu.vector_store %arg11[%c4, %c0_15], %16 {strides = array<i32>} : memref<36x286xf32, #tpu.memory_space<vmem>>, vector<4x286xf32>,
    %c0_16 = arith.constant 0 : index
    %c2 = arith.constant 2 : index
    %18 = vector.load %arg10[%c0_16, %c2] : memref<4x324xf32, #tpu.memory_space<vmem>>, vector<4x286xf32>
    %c8 = arith.constant 8 : index
    %c0_17 = arith.constant 0 : index
    %19 = vector.load %arg11[%c8, %c0_17] : memref<36x286xf32, #tpu.memory_space<vmem>>, vector<4x286xf32>
    tpu.vector_store %arg11[%c8, %c0_17], %18 {strides = array<i32>} : memref<36x286xf32, #tpu.memory_space<vmem>>, vector<4x286xf32>,
    %c0_18 = arith.constant 0 : index
    %c18 = arith.constant 18 : index
    %20 = vector.load %arg10[%c0_18, %c18] : memref<4x324xf32, #tpu.memory_space<vmem>>, vector<4x286xf32>
    %c12 = arith.constant 12 : index
    %c0_19 = arith.constant 0 : index
    %21 = vector.load %arg11[%c12, %c0_19] : memref<36x286xf32, #tpu.memory_space<vmem>>, vector<4x286xf32>
    tpu.vector_store %arg11[%c12, %c0_19], %20 {strides = array<i32>} : memref<36x286xf32, #tpu.memory_space<vmem>>, vector<4x286xf32>,
    %c0_20 = arith.constant 0 : index
    %c19 = arith.constant 19 : index
    %22 = vector.load %arg10[%c0_20, %c19] : memref<4x324xf32, #tpu.memory_space<vmem>>, vector<4x286xf32>
    %c16 = arith.constant 16 : index
    %c0_21 = arith.constant 0 : index
    %23 = vector.load %arg11[%c16, %c0_21] : memref<36x286xf32, #tpu.memory_space<vmem>>, vector<4x286xf32>
    tpu.vector_store %arg11[%c16, %c0_21], %22 {strides = array<i32>} : memref<36x286xf32, #tpu.memory_space<vmem>>, vector<4x286xf32>,
    %c0_22 = arith.constant 0 : index
    %c20 = arith.constant 20 : index
    %24 = vector.load %arg10[%c0_22, %c20] : memref<4x324xf32, #tpu.memory_space<vmem>>, vector<4x286xf32>
    %c20_23 = arith.constant 20 : index
    %c0_24 = arith.constant 0 : index
    %25 = vector.load %arg11[%c20_23, %c0_24] : memref<36x286xf32, #tpu.memory_space<vmem>>, vector<4x286xf32>
    tpu.vector_store %arg11[%c20_23, %c0_24], %24 {strides = array<i32>} : memref<36x286xf32, #tpu.memory_space<vmem>>, vector<4x286xf32>,
    %c0_25 = arith.constant 0 : index
    %c36 = arith.constant 36 : index
    %26 = vector.load %arg10[%c0_25, %c36] : memref<4x324xf32, #tpu.memory_space<vmem>>, vector<4x286xf32>
    %c24 = arith.constant 24 : index
    %c0_26 = arith.constant 0 : index
    %27 = vector.load %arg11[%c24, %c0_26] : memref<36x286xf32, #tpu.memory_space<vmem>>, vector<4x286xf32>
    tpu.vector_store %arg11[%c24, %c0_26], %26 {strides = array<i32>} : memref<36x286xf32, #tpu.memory_space<vmem>>, vector<4x286xf32>,
    %c0_27 = arith.constant 0 : index
    %c37 = arith.constant 37 : index
    %28 = vector.load %arg10[%c0_27, %c37] : memref<4x324xf32, #tpu.memory_space<vmem>>, vector<4x286xf32>
    %c28 = arith.constant 28 : index
    %c0_28 = arith.constant 0 : index
    %29 = vector.load %arg11[%c28, %c0_28] : memref<36x286xf32, #tpu.memory_space<vmem>>, vector<4x286xf32>
    tpu.vector_store %arg11[%c28, %c0_28], %28 {strides = array<i32>} : memref<36x286xf32, #tpu.memory_space<vmem>>, vector<4x286xf32>,
    %c0_29 = arith.constant 0 : index
    %c38 = arith.constant 38 : index
    %30 = vector.load %arg10[%c0_29, %c38] : memref<4x324xf32, #tpu.memory_space<vmem>>, vector<4x286xf32>
    %c32 = arith.constant 32 : index
    %c0_30 = arith.constant 0 : index
    %31 = vector.load %arg11[%c32, %c0_30] : memref<36x286xf32, #tpu.memory_space<vmem>>, vector<4x286xf32>
    tpu.vector_store %arg11[%c32, %c0_30], %30 {strides = array<i32>} : memref<36x286xf32, #tpu.memory_space<vmem>>, vector<4x286xf32>,
    %c0_31 = arith.constant 0 : index
    %c0_32 = arith.constant 0 : index
    %32 = vector.load %arg4[%c0_31, %c0_32] : memref<8x36xf32, #tpu.memory_space<vmem>>, vector<8x36xf32>
    %c0_33 = arith.constant 0 : index
    %c0_34 = arith.constant 0 : index
    %33 = vector.load %arg11[%c0_33, %c0_34] : memref<36x286xf32, #tpu.memory_space<vmem>>, vector<36x286xf32>
    %cst_35 = arith.constant dense<0.000000e+00> : vector<8x286xf32>
    %34 = tpu.matmul %32, %33, %cst_35 {dimension_numbers = #tpu.dot_dimension_numbers<[1], [0], [0], [1], [0, 0, 1, 1], [], []>} : vector<8x36xf32>, vector<36x286xf32>, vector<8x286xf32> -> vector<8x286xf32>
    %c0_36 = arith.constant 0 : index
    %c0_37 = arith.constant 0 : index
    %35 = vector.load %arg6[%c0_36, %c0_37] : memref<1x286xf32, #tpu.memory_space<vmem>>, vector<1x286xf32>
    %36 = vector.broadcast %35 : vector<1x286xf32> to vector<8x286xf32>
    %37 = arith.mulf %34, %36 : vector<8x286xf32>
    %cst_38 = arith.constant dense<0.000000e+00> : vector<8xf32>
    %38 = vector.multi_reduction <add>, %37, %cst_38 [1] : vector<8x286xf32> to vector<8xf32>
    %39 = vector.shape_cast %38 : vector<8xf32> to vector<8x1xf32>
    %c0_39 = arith.constant 0 : index
    %c0_40 = arith.constant 0 : index
    %c0_41 = arith.constant 0 : index
    %40 = vector.load %arg8[%c0_39, %c0_40, %c0_41] : memref<1x8x1xf32, #tpu.memory_space<vmem>>, vector<1x8x1xf32>
    %41 = vector.shape_cast %40 : vector<1x8x1xf32> to vector<8x1xf32>
    %42 = vector.shape_cast %39 : vector<8x1xf32> to vector<1x8x1xf32>
    tpu.vector_store %arg8[%c0_39, %c0_40, %c0_41], %42 {strides = array<i32>} : memref<1x8x1xf32, #tpu.memory_space<vmem>>, vector<1x8x1xf32>,
    %43 = arith.mulf %37, %34 : vector<8x286xf32>
    %cst_42 = arith.constant dense<0.000000e+00> : vector<8xf32>
    %44 = vector.multi_reduction <add>, %43, %cst_42 [1] : vector<8x286xf32> to vector<8xf32>
    %45 = vector.shape_cast %44 : vector<8xf32> to vector<8x1xf32>
    %c0_43 = arith.constant 0 : index
    %c0_44 = arith.constant 0 : index
    %c0_45 = arith.constant 0 : index
    %46 = vector.load %arg9[%c0_43, %c0_44, %c0_45] : memref<1x8x1xf32, #tpu.memory_space<vmem>>, vector<1x8x1xf32>
    %47 = vector.shape_cast %46 : vector<1x8x1xf32> to vector<8x1xf32>
    %48 = vector.shape_cast %45 : vector<8x1xf32> to vector<1x8x1xf32>
    tpu.vector_store %arg9[%c0_43, %c0_44, %c0_45], %48 {strides = array<i32>} : memref<1x8x1xf32, #tpu.memory_space<vmem>>, vector<1x8x1xf32>,
    %c0_46 = arith.constant 0 : index
    %c0_47 = arith.constant 0 : index
    %c0_48 = arith.constant 0 : index
    %49 = vector.load %arg7[%c0_46, %c0_47, %c0_48] : memref<1x8x286xf32, #tpu.memory_space<vmem>>, vector<1x8x286xf32>
    %50 = vector.shape_cast %49 : vector<1x8x286xf32> to vector<8x286xf32>
    %51 = vector.shape_cast %34 : vector<8x286xf32> to vector<1x8x286xf32>
    tpu.vector_store %arg7[%c0_46, %c0_47, %c0_48], %51 {strides = array<i32>} : memref<1x8x286xf32, #tpu.memory_space<vmem>>, vector<1x8x286xf32>,
    return
  }
  func.func @transform_0(%arg0: i32) -> (i32, i32, i32) {
    %c0_i32 = arith.constant 0 : i32
    %c0_i32_0 = arith.constant 0 : i32
    %c0_i32_1 = arith.constant 0 : i32
    return %arg0, %c0_i32, %c0_i32_0 : i32, i32, i32
  }
  func.func @transform_1(%arg0: i32) -> (i32, i32) {
    %c0_i32 = arith.constant 0 : i32
    %c0_i32_0 = arith.constant 0 : i32
    %c0_i32_1 = arith.constant 0 : i32
    return %c0_i32, %c0_i32_0 : i32, i32
  }
  func.func @transform_2(%arg0: i32) -> (i32, i32) {
    %c0_i32 = arith.constant 0 : i32
    %c0_i32_0 = arith.constant 0 : i32
    %c0_i32_1 = arith.constant 0 : i32
    return %c0_i32, %c0_i32_0 : i32, i32
  }
  func.func @transform_3(%arg0: i32) -> (i32, i32) {
    %c0_i32 = arith.constant 0 : i32
    %c0_i32_0 = arith.constant 0 : i32
    %c0_i32_1 = arith.constant 0 : i32
    return %c0_i32, %c0_i32_0 : i32, i32
  }
  func.func @transform_4(%arg0: i32) -> (i32, i32) {
    %c0_i32 = arith.constant 0 : i32
    %c0_i32_0 = arith.constant 0 : i32
    %c0_i32_1 = arith.constant 0 : i32
    return %c0_i32, %c0_i32_0 : i32, i32
  }
  func.func @transform_5(%arg0: i32) -> (i32, i32) {
    %c0_i32 = arith.constant 0 : i32
    %c0_i32_0 = arith.constant 0 : i32
    %c0_i32_1 = arith.constant 0 : i32
    return %c0_i32, %c0_i32_0 : i32, i32
  }
  func.func @transform_6(%arg0: i32) -> (i32, i32, i32) {
    %c0_i32 = arith.constant 0 : i32
    %c0_i32_0 = arith.constant 0 : i32
    %c0_i32_1 = arith.constant 0 : i32
    return %arg0, %c0_i32, %c0_i32_0 : i32, i32, i32
  }
  func.func @transform_7(%arg0: i32) -> (i32, i32, i32) {
    %c0_i32 = arith.constant 0 : i32
    %c0_i32_0 = arith.constant 0 : i32
    %c0_i32_1 = arith.constant 0 : i32
    return %arg0, %c0_i32, %c0_i32_0 : i32, i32, i32
  }
  func.func @transform_8(%arg0: i32) -> (i32, i32, i32) {
    %c0_i32 = arith.constant 0 : i32
    %c0_i32_0 = arith.constant 0 : i32
    %c0_i32_1 = arith.constant 0 : i32
    return %arg0, %c0_i32, %c0_i32_0 : i32, i32, i32
  }
}

module attributes {stable_mosaic.version = 11 : i64} {
  func.func @_stage3_kernel(%arg0: i32, %arg1: memref<1x8x286xf32, #tpu.memory_space<vmem>>, %arg2: memref<8x1xf32, #tpu.memory_space<vmem>>, %arg3: memref<8x1xf32, #tpu.memory_space<vmem>>, %arg4: memref<1x8x286xf32, #tpu.memory_space<vmem>>) attributes {dimension_semantics = [#tpu.dimension_semantics<parallel>], iteration_bounds = array<i64: 2>, scalar_prefetch = 0 : i64, scratch_operands = 0 : i64, tpu.core_type = #tpu.core_type<tc>, window_params = [{transform_indices = @transform_0, window_bounds = array<i64: 1, 8, 286>}, {pipeline_mode = #tpu.pipeline_mode<synchronous>, transform_indices = @transform_1, window_bounds = array<i64: 8, 1>}, {pipeline_mode = #tpu.pipeline_mode<synchronous>, transform_indices = @transform_2, window_bounds = array<i64: 8, 1>}, {transform_indices = @transform_3, window_bounds = array<i64: 1, 8, 286>}]} {
    %c0 = arith.constant 0 : index
    %c0_0 = arith.constant 0 : index
    %c0_1 = arith.constant 0 : index
    %0 = vector.load %arg1[%c0, %c0_0, %c0_1] : memref<1x8x286xf32, #tpu.memory_space<vmem>>, vector<1x8x286xf32>
    %1 = vector.shape_cast %0 : vector<1x8x286xf32> to vector<8x286xf32>
    %c0_2 = arith.constant 0 : index
    %c0_3 = arith.constant 0 : index
    %2 = vector.load %arg2[%c0_2, %c0_3] : memref<8x1xf32, #tpu.memory_space<vmem>>, vector<8x1xf32>
    %3 = vector.broadcast %2 : vector<8x1xf32> to vector<8x286xf32>
    %4 = arith.mulf %1, %3 : vector<8x286xf32>
    %c0_4 = arith.constant 0 : index
    %c0_5 = arith.constant 0 : index
    %5 = vector.load %arg3[%c0_4, %c0_5] : memref<8x1xf32, #tpu.memory_space<vmem>>, vector<8x1xf32>
    %6 = vector.broadcast %5 : vector<8x1xf32> to vector<8x286xf32>
    %7 = arith.addf %4, %6 : vector<8x286xf32>
    %cst = arith.constant 0.000000e+00 : f32
    %8 = vector.broadcast %cst : f32 to vector<8x286xf32>
    %9 = arith.maximumf %7, %8 : vector<8x286xf32>
    %c0_6 = arith.constant 0 : index
    %c0_7 = arith.constant 0 : index
    %c0_8 = arith.constant 0 : index
    %10 = vector.load %arg4[%c0_6, %c0_7, %c0_8] : memref<1x8x286xf32, #tpu.memory_space<vmem>>, vector<1x8x286xf32>
    %11 = vector.shape_cast %10 : vector<1x8x286xf32> to vector<8x286xf32>
    %12 = vector.shape_cast %9 : vector<8x286xf32> to vector<1x8x286xf32>
    tpu.vector_store %arg4[%c0_6, %c0_7, %c0_8], %12 {strides = array<i32>} : memref<1x8x286xf32, #tpu.memory_space<vmem>>, vector<1x8x286xf32>,
    return
  }
  func.func @transform_0(%arg0: i32) -> (i32, i32, i32) {
    %c0_i32 = arith.constant 0 : i32
    %c0_i32_0 = arith.constant 0 : i32
    %c0_i32_1 = arith.constant 0 : i32
    return %arg0, %c0_i32, %c0_i32_0 : i32, i32, i32
  }
  func.func @transform_1(%arg0: i32) -> (i32, i32) {
    %c0_i32 = arith.constant 0 : i32
    %c0_i32_0 = arith.constant 0 : i32
    %c0_i32_1 = arith.constant 0 : i32
    return %c0_i32, %c0_i32_0 : i32, i32
  }
  func.func @transform_2(%arg0: i32) -> (i32, i32) {
    %c0_i32 = arith.constant 0 : i32
    %c0_i32_0 = arith.constant 0 : i32
    %c0_i32_1 = arith.constant 0 : i32
    return %c0_i32, %c0_i32_0 : i32, i32
  }
  func.func @transform_3(%arg0: i32) -> (i32, i32, i32) {
    %c0_i32 = arith.constant 0 : i32
    %c0_i32_0 = arith.constant 0 : i32
    %c0_i32_1 = arith.constant 0 : i32
    return %arg0, %c0_i32, %c0_i32_0 : i32, i32, i32
  }
}

</mosaic_0001>

<bundles_post_ra>
// kernel: adapter_forward.5
= control target key start
LH: loop header
LB: loop body
LE: loop exit
PB: predicated region body
PF: predicated region fallthrough
CT: control target
= control target key end

     0   :  { %s303_s12 = smov 0   ;;  %s326_s0 = inlined_call_operand.vmem [shape: f32[2,8,286], index: 0, kind: input, shape index: {}]   ;;  %s327_s1 = inlined_call_operand.vmem [shape: f32[8,1], index: 1, kind: input, shape index: {}]   ;;  %s328_s2 = inlined_call_operand.vmem [shape: f32[8,1], index: 2, kind: input, shape index: {}]   ;;  %s329_s3 = inlined_call_operand.vmem [shape: f32[2,8,286], index: 3, kind: output, shape index: {}]  }
   0x1 LB: > { %s254_s13 = sadd.s32 4294967295, %s280_s12   ;;  %p258_p0 = scmp.ge.s32.totalorder %s280_s12, 1  ;;  %s280_s12 = sphi %s303_s12, %s13_s12  }
   0x2   : > { %p137_p1 = scmp.lt.s32.totalorder %s280_s12, 3 }
   0x4   : > { %p138_p2 = pnand %p258_p0, %p137_p1 }
   0x5   : > { %v174_v0 = vld [vmem:[%s327_s1] sm:$0xff] (!%p138_p2)  ;;  %v282_v1 = vmov (!%p138_p2), 0   ;;  %p161_p3 = scmp.lt.s32.totalorder (!%p138_p2), %s254_s13, 1  ;;  %vm197_vm0 = vcmask (!%p138_p2), 244736  }
   0x6   : > { %141 = sbr.rel (%p138_p2) target bundleno = 145 (0x91), region = 32  ;;  %273 = vset.pattern.permute.xlu0 (!%p138_p2), %v282_v1  ;;  %v183_v2 = vld [vmem:[%s328_s2] sm:$0xff] (!%p138_p2) }
   0x7   : > { %177 = vperm.xlu0 (!%p138_p2), %273, %v174_v0  }
   0xb   : > { %186 = vperm.xlu0 (!%p138_p2), %273, %v183_v2  }
   0xd   : > { %s331_s13 = smov (!%p161_p3, %s254_s13), 1 }
   0xe   : > { %s263_s18 = smul.u32 24, %s331_s13 }
  0x10   : > { %s165_s21 = scalar_lea.vmem %s326_s0, %s263_s18  ;;  %s170_s24 = scalar_lea.vmem %s329_s3, %s263_s18 }
  0x11   : > { %v171_v4 = vld [vmem:[%s165_s21] sm:$0xff]  ;;  %v172_v5 = vld [vmem:[%s165_s21 + $0x8] sm:$0xff]  ;;  %v173_v6 = vld [vmem:[%s165_s21 + $0x10] sm:$0xff] }
  0x86   : > { %v178_v3 = vpop.permute.xlu0 %177 }
  0x87   : > { %v180_v7 = vmul.f32 %v178_v3, %v171_v4  ;;  %v181_v8 = vmul.f32 %v178_v3, %v172_v5  ;;  %v182_v9 = vmul.f32 %v178_v3, %v173_v6 }
  0x8a   : > { %v187_v10 = vpop.permute.xlu0 %186 }
  0x8b   : > { %v189_v11 = vadd.f32 %v187_v10, %v180_v7  ;;  %v190_v12 = vadd.f32 %v187_v10, %v181_v8  ;;  %v191_v13 = vadd.f32 %v187_v10, %v182_v9 }
  0x8d   : > { %v192_v14 = vmax.f32 %v189_v11, 0.0  ;;  %v193_v15 = vmax.f32 %v190_v12, 0.0  ;;  %v194_v16 = vmax.f32 %v191_v13, 0.0 }
  0x8f   : > { %195 = vst [vmem:[%s170_s24] sm:$0xff] %v192_v14  ;;  %196 = vst [vmem:[%s170_s24 + $0x8] sm:$0xff] %v193_v15 }
  0x90   : > { %198 = vst.msk [vmem:[%s170_s24 + $0x10] sm:$0xff] %vm197_vm0, %v194_v16 }
  0x91 PF: > { %s13_s12 = sadd.s32 1, %s280_s12  }
  0x92   : > { %p10_p4 = scmp.ge.s32.totalorder %s13_s12, 4  }
  0x94   :  { %12 = sbr.rel (!%p10_p4) target bundleno = 1 (0x1), region = 62 }

// kernel: adapter_forward.3
= control target key start
LH: loop header
LB: loop body
LE: loop exit
PB: predicated region body
PF: predicated region fallthrough
CT: control target
= control target key end

     0   :  { %s897_s18 = smov 0   ;;  %s983_s0 = inlined_call_operand.vmem [shape: f32[2,4,324], index: 0, kind: input, shape index: {}]   ;;  %s984_s1 = inlined_call_operand.vmem [shape: f32[4,36], index: 1, kind: input, shape index: {}]   ;;  %s985_s2 = inlined_call_operand.vmem [shape: f32[1,286], index: 2, kind: input, shape index: {}]   ;;  %s986_s3 = inlined_call_operand.vmem [shape: f32[2,4,324], index: 3, kind: output, shape index: {0}]   ;;  %s987_s4 = inlined_call_operand.vmem [shape: f32[2,4,1], index: 4, kind: output, shape index: {1}]   ;;  %s988_s5 = inlined_call_operand.vmem [shape: f32[2,4,1], index: 5, kind: output, shape index: {2}]  }
   0x1 LB: > { %s771_s19 = sadd.s32 4294967295, %s853_s18   ;;  %p775_p0 = scmp.ge.s32.totalorder %s853_s18, 1  ;;  %s853_s18 = sphi %s897_s18, %s16_s18  }
   0x2   : > { %p192_p1 = scmp.lt.s32.totalorder %s853_s18, 3 }
   0x4   : > { %p193_p2 = pnand %p775_p0, %p192_p1 }
   0x5   : > { %p228_p3 = scmp.lt.s32.totalorder (!%p193_p2), %s771_s19, 1  ;;  %s855_s24 = smov (!%p193_p2), 126   ;;  %vm253_vm0 = vcmask (!%p193_p2), 240640   ;;  %v858_v6 = vmov (!%p193_p2), 0.0|0.0   ;;  %v863_v12 = vmov (!%p193_p2), 0.0   ;;  %vm865_vm1 = vmmov (!%p193_p2), 0  }
   0x6   : > { %196 = sbr.rel (%p193_p2) target bundleno = 560 (0x230), region = 32  ;;  %s856_s25 = smov (!%p193_p2), 127   ;;  %814 = vmatprep.subr.bf16.mxu1 (!%p193_p2), %v858_v6  ;;  %514 = vmatprep.mubr.f32.mxu0 (!%p193_p2), %v863_v12  ;;  %vm288_vm2 = vcmask (!%p193_p2), 1031168   ;;  %vm275_vm3 = vcmask (!%p193_p2), 244740   ;;  %vm309_vm4 = vcmask (!%p193_p2), 900096   ;;  %vm267_vm5 = vcmask (!%p193_p2), 1039360  }
   0x7   : > { %s857_s26 = smov (!%p193_p2), 110   ;;  %s859_s27 = smov (!%p193_p2), 109   ;;  %803 = vmatprep.mubr.msk.f32.mxu1 (!%p193_p2), %vm865_vm1, %v863_v12  ;;  %vm329_vm6 = vcmask (!%p193_p2), 891904   ;;  %vm350_vm7 = vcmask (!%p193_p2), 883712   ;;  %vm370_vm8 = vcmask (!%p193_p2), 752640   ;;  %vm391_vm9 = vcmask (!%p193_p2), 744448  }
   0x8   : > { %s860_s28 = smov (!%p193_p2), 108   ;;  %s861_s29 = smov (!%p193_p2), 92   ;;  %vm411_vm10 = vcmask (!%p193_p2), 736256   ;;  %vm440_vm11 = vcmask (!%p193_p2), 1043456   ;;  %vm436_vm12 = vcmask (!%p193_p2), 293888   ;;  %vm632_vm13 = vcmask (!%p193_p2), 551936  }
   0x9   : > { %s862_s30 = smov (!%p193_p2), 91   ;;  %s864_s6 = smov (!%p193_p2), 90   ;;  %vm618_vm14 = vcmask (!%p193_p2), 3072   ;;  %vm648_vm15 = vcmask (!%p193_p2), 1043608   ;;  %vm643_vm1 = vcmask (!%p193_p2), 154624  }
   0xa   : > { %s866_s14 = smov (!%p193_p2), 19  }
   0xd   : > { %s990_s19 = smov (!%p228_p3, %s771_s19), 1 }
   0xe   : > { %s820_s20 = smul.u32 12, %s990_s19  ;;  %s778_s15 = sshll.u32 %s990_s19, 2 }
   0xf   : > { %s241_s21 = scalar_lea.vmem %s987_s4, %s778_s15 }
  0x10   : > { %s913_s23 = scalar_lea.vmem %s983_s0, %s820_s20  ;;  %s237_s13 = scalar_lea.vmem %s986_s3, %s820_s20 }
  0x11   : > { %v278_v0 = vld [vmem:[%s913_s23 + $0x8] sm:$0xf]  ;;  %v255_v1 = vld [vmem:[%s913_s23] sm:$0xff]  ;;  %631 = vst [vmem:[%s237_s13] sm:$0xff] %v863_v12  ;;  %633 = vst.msk [vmem:[%s237_s13 + $0x8] sm:$0xf] %vm632_vm13, %v863_v12 }
  0x12   : > { %286 = vrot.lane.b32.xlu1 %v278_v0, %s855_s24  ;;  %263 = vrot.lane.b32.xlu0 %v255_v1, %s856_s25  ;;  %v281_v2 = vcombine.high %v255_v1, %v255_v1  ;;  %251 = vst [vmem:[#allocation2] sm:$0xf] %v255_v1  ;;  %v247_v3 = vld [vmem:[%s913_s23 + $0x8] sm:$0xf]  ;;  %v259_v7 = vcombine.low %v255_v1, %v255_v1 }
  0x13   : > { %v843_v4 = vld [vmem:[%s913_s23 + $0x8] ss:$0 sps:$4 sm:$0xff]   ;;  %254 = vst.msk [vmem:[#allocation2 + $0x10] sm:$0xf] %vm253_vm0, %v247_v3 }
  0x14   : > { %252 = vst [vmem:[#allocation2 + $0x8] sm:$0xf] %v281_v2  ;;  %v844_v5 = vld [vmem:[%s913_s23 + $0x8] ss:$0 sps:$4 sm:$0xff]  }
  0x15   : > { %v319_v8 = vld [vmem:[%s913_s23 + $0x8] sm:$0xf] }
  0x16   : > { %284 = vrot.lane.b32.xlu1 %v281_v2, %s855_s24  ;;  %305 = vrot.lane.b32.xlu0 %v255_v1, %s857_s26  ;;  %v845_v9 = vld [vmem:[%s913_s23 + $0x8] ss:$0 sps:$4 sm:$0xff]  }
  0x17   : > { %v360_v10 = vld [vmem:[%s913_s23 + $0x8] sm:$0xf] }
  0x18   : > { %v846_v11 = vld [vmem:[%s913_s23 + $0x8] ss:$0 sps:$4 sm:$0xff]  }
  0x19   : > { %v401_v13 = vld [vmem:[%s913_s23 + $0x8] sm:$0xf] }
  0x1a   : > { %307 = vrot.lane.b32.xlu1 %v843_v4, %s857_s26  ;;  %265 = vrot.lane.b32.xlu0 %v844_v5, %s856_s25 }
  0x1e   : > { %282 = vrot.lane.b32.xlu1 %v255_v1, %s855_s24  ;;  %261 = vrot.lane.b32.xlu0 %v259_v7, %s856_s25  ;;  %s245_s24 = scalar_lea.vmem %s988_s5, %s778_s15 }
  0x22   : > { %325 = vrot.lane.b32.xlu1 %v281_v2, %s859_s27  ;;  %303 = vrot.lane.b32.xlu0 %v259_v7, %s857_s26 }
  0x26   : > { %346 = vrot.lane.b32.xlu1 %v255_v1, %s860_s28  ;;  %327 = vrot.lane.b32.xlu0 %v319_v8, %s859_s27  ;;  %v420_v8 = vld [vmem:[%s984_s1] sm:$0xf] }
  0x2a   : > { %366 = vrot.lane.b32.xlu1 %v281_v2, %s861_s29  ;;  %348 = vrot.lane.b32.xlu0 %v845_v9, %s860_s28 }
  0x2e   : > { %387 = vrot.lane.b32.xlu1 %v255_v1, %s862_s30  ;;  %368 = vrot.lane.b32.xlu0 %v360_v10, %s861_s29 }
  0x32   : > { %323 = vrot.lane.b32.xlu1 %v255_v1, %s859_s27  ;;  %389 = vrot.lane.b32.xlu0 %v846_v11, %s862_s30 }
  0x36   : > { %364 = vrot.lane.b32.xlu1 %v255_v1, %s861_s29  ;;  %344 = vrot.lane.b32.xlu0 %v259_v7, %s860_s28 }
  0x3a   : > { %407 = vrot.lane.b32.xlu1 %v281_v2, %s864_s6  ;;  %385 = vrot.lane.b32.xlu0 %v259_v7, %s862_s30 }
  0x3e   : > { %405 = vrot.lane.b32.xlu1 %v255_v1, %s864_s6  ;;  %409 = vrot.lane.b32.xlu0 %v401_v13, %s864_s6  ;;  %v593_v13 = vlaneseq }
  0x84   : > { %v287_v14 = vpop.permute.xlu1 %286  ;;  %v264_v15 = vpop.permute.xlu0 %263 }
  0x85   : > { %296 = vst.msk [vmem:[#allocation2 + $0x28] sm:$0xf] %vm253_vm0, %v287_v14 }
  0x88   : > { %v285_v16 = vpop.permute.xlu1 %284  ;;  %v306_v17 = vpop.permute.xlu0 %305 }
  0x89   : > { %v290_v18 = vsel %vm288_vm2, %v285_v16, %v287_v14  ;;  %v594_v14 = vshrl.u32 %v593_v13, 7 }
  0x8a   : > { %295 = vst [vmem:[#allocation2 + $0x20] sm:$0xf] %v290_v18 }
  0x8b   : > { %v599_v18 = vsub.s32 1, %v594_v14 }
  0x8c   : > { %v308_v19 = vpop.permute.xlu1 %307  ;;  %v266_v20 = vpop.permute.xlu0 %265 }
  0x8d   : > { %v311_v21 = vsel %vm309_vm4, %v306_v17, %v308_v19  ;;  %317 = vst.msk [vmem:[#allocation2 + $0x28] sm:$0xf0] %vm275_vm3, %v308_v19  ;;  %v269_v22 = vsel %vm267_vm5, %v264_v15, %v266_v20  ;;  %276 = vst.msk [vmem:[#allocation2 + $0x10] sm:$0xf0] %vm275_vm3, %v266_v20 }
  0x8e   : > { %316 = vst [vmem:[#allocation2 + $0x20] sm:$0xf0] %v311_v21  ;;  %274 = vst [vmem:[#allocation2 + $0x8] sm:$0xf0] %v269_v22 }
  0x90   : > { %v283_v23 = vpop.permute.xlu1 %282  ;;  %v262_v24 = vpop.permute.xlu0 %261 }
  0x91   : > { %v289_v25 = vsel %vm288_vm2, %v283_v23, %v285_v16  ;;  %v268_v26 = vsel %vm267_vm5, %v262_v24, %v264_v15  ;;  %v603_v15 = vsub.s32 2, %v594_v14  ;;  %v591_v16 = vld [vmem:[%s985_s2] sm:$0x7] }
  0x92   : > { %294 = vst [vmem:[#allocation2 + $0x18] sm:$0xf] %v289_v25  ;;  %273 = vst [vmem:[#allocation2] sm:$0xf0] %v268_v26  ;;  %v600_v22 = vrot.slane %v591_v16, %v599_v18 }
  0x93   : > { %v604_v19 = vrot.slane %v591_v16, %v603_v15 }
  0x94   : > { %v326_v27 = vpop.permute.xlu1 %325  ;;  %v304_v28 = vpop.permute.xlu0 %303  ;;  %v423_v29 = vld [vmem:[#allocation2 + $0x10] sm:$0xff]  ;;  %v426_v30 = vld [vmem:[#allocation2 + $0x28] sm:$0xff] }
  0x95   : > { %v310_v31 = vsel %vm309_vm4, %v304_v28, %v306_v17  ;;  %v815_v32 = vpack.c.bf16 %v426_v30, %v423_v29  ;;  %v422_v33 = vld [vmem:[#allocation2 + $0x8] sm:$0xff]  ;;  %v425_v34 = vld [vmem:[#allocation2 + $0x20] sm:$0xff]  ;;  %v595_v17 = vsub.s32 0, %v594_v14 }
  0x96   : > { %315 = vst [vmem:[#allocation2 + $0x18] sm:$0xf0] %v310_v31  ;;  %v806_v35 = vpack.c.bf16 %v425_v34, %v422_v33 }
  0x97   : > { %816 = vmatpush3.bf16.msra.mxu1 %v815_v32  ;;  %v596_v20 = vrot.slane %v591_v16, %v595_v17 }
  0x98   : > { %v347_v36 = vpop.permute.xlu1 %346  ;;  %v328_v37 = vpop.permute.xlu0 %327  ;;  %807 = vmatprep.subr.bf16.mxu0 %v806_v35  ;;  %817 = vmatprep.subr.bf16.mxu1 %v858_v6 }
  0x99   : > { %v331_v38 = vsel %vm329_vm6, %v326_v27, %v328_v37  ;;  %337 = vst.msk [vmem:[#allocation2 + $0x40] sm:$0xf] %vm253_vm0, %v328_v37  ;;  %v421_v42 = vld [vmem:[#allocation2] sm:$0xff] }
  0x9a   : > { %336 = vst [vmem:[#allocation2 + $0x38] sm:$0xf] %v331_v38 }
  0x9c   : > { %v367_v39 = vpop.permute.xlu1 %366  ;;  %v349_v40 = vpop.permute.xlu0 %348 }
  0x9d   : > { %v352_v41 = vsel %vm350_vm7, %v347_v36, %v349_v40  ;;  %358 = vst.msk [vmem:[#allocation2 + $0x40] sm:$0xf0] %vm275_vm3, %v349_v40  ;;  %v424_v43 = vld [vmem:[#allocation2 + $0x18] sm:$0xff] }
  0x9e   : > { %357 = vst [vmem:[#allocation2 + $0x38] sm:$0xf0] %v352_v41  ;;  %v808_v44 = vpack.c.bf16 %v424_v43, %v421_v42 }
  0xa0   : > { %v388_v45 = vpop.permute.xlu1 %387  ;;  %v369_v46 = vpop.permute.xlu0 %368  ;;  %809 = vmatpush1.bf16.msra.mxu0 %v808_v44 }
  0xa1   : > { %v372_v47 = vsel %vm370_vm8, %v367_v39, %v369_v46  ;;  %378 = vst.msk [vmem:[#allocation2 + $0x58] sm:$0xf] %vm253_vm0, %v369_v46 }
  0xa2   : > { %377 = vst [vmem:[#allocation2 + $0x50] sm:$0xf] %v372_v47 }
  0xa4   : > { %v324_v48 = vpop.permute.xlu1 %323  ;;  %v390_v49 = vpop.permute.xlu0 %389  ;;  %v429_v58 = vld [vmem:[#allocation2 + $0x40] sm:$0xff] }
  0xa5   : > { %v330_v50 = vsel %vm329_vm6, %v324_v48, %v326_v27  ;;  %v393_v51 = vsel %vm391_vm9, %v388_v45, %v390_v49  ;;  %399 = vst.msk [vmem:[#allocation2 + $0x58] sm:$0xf0] %vm275_vm3, %v390_v49  ;;  %v428_v62 = vld [vmem:[#allocation2 + $0x38] sm:$0xff]  ;;  %vm652_vm3 = vcmask 396288  }
  0xa6   : > { %335 = vst [vmem:[#allocation2 + $0x30] sm:$0xf] %v330_v50  ;;  %398 = vst [vmem:[#allocation2 + $0x50] sm:$0xf0] %v393_v51 }
  0xa8   : > { %v365_v52 = vpop.permute.xlu1 %364  ;;  %v345_v53 = vpop.permute.xlu0 %344 }
  0xa9   : > { %v371_v54 = vsel %vm370_vm8, %v365_v52, %v367_v39  ;;  %v351_v55 = vsel %vm350_vm7, %v345_v53, %v347_v36 }
  0xaa   : > { %376 = vst [vmem:[#allocation2 + $0x48] sm:$0xf] %v371_v54  ;;  %356 = vst [vmem:[#allocation2 + $0x30] sm:$0xf0] %v351_v55 }
  0xac   : > { %v408_v56 = vpop.permute.xlu1 %407  ;;  %v386_v57 = vpop.permute.xlu0 %385  ;;  %v432_v59 = vld [vmem:[#allocation2 + $0x58] sm:$0xff] }
  0xad   : > { %v392_v60 = vsel %vm391_vm9, %v386_v57, %v388_v45  ;;  %v818_v61 = vpack.c.bf16 %v432_v59, %v429_v58  ;;  %v431_v63 = vld [vmem:[#allocation2 + $0x50] sm:$0xff] }
  0xae   : > { %397 = vst [vmem:[#allocation2 + $0x48] sm:$0xf0] %v392_v60  ;;  %v810_v0 = vpack.c.bf16 %v431_v63, %v428_v62 }
  0xaf   : > { %819 = vmatpush3.bf16.msra.mxu1 %v818_v61 }
  0xb0   : > { %v406_v1 = vpop.permute.xlu1 %405  ;;  %v410_v2 = vpop.permute.xlu0 %409  ;;  %811 = vmatprep.subr.bf16.mxu0 %v810_v0  ;;  %801 = vmatprep.subr.mxu1 %v863_v12 }
  0xb1   : > { %v412_v3 = vsel %vm411_vm10, %v406_v1, %v408_v56  ;;  %v413_v4 = vsel %vm411_vm10, %v408_v56, %v410_v2  ;;  %419 = vst.msk [vmem:[#allocation2 + $0x70] sm:$0xf] %vm253_vm0, %v410_v2  ;;  %v427_v5 = vld [vmem:[#allocation2 + $0x30] sm:$0xff] }
  0xb2   : > { %417 = vst [vmem:[#allocation2 + $0x60] sm:$0xf] %v412_v3  ;;  %418 = vst [vmem:[#allocation2 + $0x68] sm:$0xf] %v413_v4 }
  0xb5   : > { %v430_v6 = vld [vmem:[#allocation2 + $0x48] sm:$0xff] }
  0xb6   : > { %v812_v7 = vpack.c.bf16 %v430_v6, %v427_v5 }
  0xb8   : > { %813 = vmatpush1.bf16.msra.mxu0 %v812_v7  ;;  %v435_v9 = vld [vmem:[#allocation2 + $0x70] sm:$0xf] }
  0xb9   : > { %v434_v10 = vld [vmem:[#allocation2 + $0x68] sm:$0xf]  ;;  %802 = vmatpush3.msk.msra.mxu1 %vm440_vm11, %v435_v9  ;;  %v433_v11 = vld [vmem:[#allocation2 + $0x60] sm:$0xf] }
  0xba   : > { %780 = vmatprep.subr.msk.mxu0 %vm440_vm11, %v434_v10  ;;  %804 = vmatmul.mubr.msk.f32.vlgmr.msra.gmra.mrb[0].mxu1 %vm436_vm12, %v420_v8 }
  0xbc   : > { %781 = vmatpush1.msk.msra.mxu0 %vm440_vm11, %v433_v11 }
  0xbd   : > { %782 = vmatmul.mubr.msk.f32.vlgmr.msra.gmra.mrb[0].mxu0 %vm436_vm12, %v420_v8 }
 0x18d   : > { %v587_v21 = vpop.f32.mrb[0].mxu1 }
 0x18e   : > { %v805_v23 = vpop.f32.mrb[1].mxu1  ;;  %v610_v24 = vmul.f32 %v604_v19, %v587_v21 }
 0x190   : > { %v516_v25 = vpop.f32.mrb[0].mxu0  ;;  %v622_v30 = vmul.f32 %v610_v24, %v587_v21  ;;  %v614_v34 = vsel %vm253_vm0, %v610_v24, 0.0 }
 0x191   : > { %v608_v26 = vmul.f32 %v596_v20, %v516_v25  ;;  %v518_v27 = vpop.f32.mrb[1].mxu0 }
 0x192   : > { %v609_v28 = vmul.f32 %v600_v22, %v518_v27  ;;  %v626_v41 = vsel %vm253_vm0, %v622_v30, 0.0  ;;  %vm649_vm0 = vcmask 1047556  }
 0x193   : > { %v620_v29 = vmul.f32 %v608_v26, %v516_v25  ;;  %v611_v31 = vsel %vm440_vm11, %v608_v26, 0.0  ;;  %vm650_vm2 = vmor %vm649_vm0, %vm648_vm15 }
 0x194   : > { %v621_v32 = vmul.f32 %v609_v28, %v518_v27  ;;  %v612_v33 = vsel %vm440_vm11, %v609_v28, 0.0  ;;  %v637_v35 = vcombine.low %v608_v26, %v609_v28 }
 0x195   : > { %v623_v36 = vsel %vm440_vm11, %v620_v29, 0.0  ;;  %v613_v37 = vadd.f32 %v612_v33, %v611_v31 }
 0x196   : > { %v624_v38 = vsel %vm440_vm11, %v621_v32, 0.0 }
 0x197   : > { %v615_v39 = vadd.f32 %v614_v34, %v613_v37  ;;  %v625_v40 = vadd.f32 %v624_v38, %v623_v36 }
 0x199   : > { %616 = vadd.xlane.f32.xlu0 %v615_v39  ;;  %v627_v42 = vadd.f32 %v626_v41, %v625_v40 }
 0x19b   : > { %628 = vadd.xlane.f32.xlu1 %v627_v42 }
 0x1ac   : > { %640 = vrot.lane.b32.xlu1 %v610_v24, %s866_s14 }
 0x1af   : > { %638 = vrot.lane.b32.xlu0 %v637_v35, %s866_s14 }
 0x226   : > { %v617_v43 = vpop.xlane.xlu0 %616 }
 0x227   : > { %619 = vst.msk [vmem:[%s241_s21] sm:$0xf] %vm618_vm14, %v617_v43 }
 0x228   : > { %v629_v44 = vpop.xlane.xlu1 %628 }
 0x229   : > { %630 = vst.msk [vmem:[%s245_s24] sm:$0xf] %vm618_vm14, %v629_v44 }
 0x22a   : > { %v639_v45 = vpop.permute.xlu0 %638 }
 0x22b   : > { %v642_v12 = vrot.slane %v639_v45, 4 }
 0x22c   : > { %v641_v46 = vpop.permute.xlu1 %640 }
 0x22d   : > { %v644_v47 = vsel %vm643_vm1, %v642_v12, %v639_v45  ;;  %v645_v48 = vsel %vm643_vm1, %v642_v12, %v641_v46 }
 0x22e   : > { %651 = vst.msk [vmem:[%s237_s13] sm:$0xff] %vm650_vm2, %v644_v47 }
 0x22f   : > { %653 = vst.msk [vmem:[%s237_s13 + $0x8] sm:$0xf] %vm652_vm3, %v645_v48 }
 0x230 PF: > { %s16_s18 = sadd.s32 1, %s853_s18  }
 0x231   : > { %p13_p4 = scmp.ge.s32.totalorder %s16_s18, 4  }
 0x233   :  { %15 = sbr.rel (!%p13_p4) target bundleno = 1 (0x1), region = 86 }

// kernel: adapter_forward.4
= control target key start
LH: loop header
LB: loop body
LE: loop exit
PB: predicated region body
PF: predicated region fallthrough
CT: control target
= control target key end

     0   :  { %s1028_s27 = smov 0   ;;  %s1128_s0 = inlined_call_operand.vmem [shape: f32[2,4,324], index: 0, kind: input, shape index: {}]   ;;  %s1129_s1 = inlined_call_operand.vmem [shape: f32[4,1], index: 1, kind: input, shape index: {}]   ;;  %s1130_s2 = inlined_call_operand.vmem [shape: f32[4,1], index: 2, kind: input, shape index: {}]   ;;  %s1131_s3 = inlined_call_operand.vmem [shape: f32[8,36], index: 3, kind: input, shape index: {}]   ;;  %s1132_s4 = inlined_call_operand.vmem [shape: f32[1,324], index: 4, kind: input, shape index: {}]   ;;  %s1133_s5 = inlined_call_operand.vmem [shape: f32[1,286], index: 5, kind: input, shape index: {}]   ;;  %s1134_s6 = inlined_call_operand.vmem [shape: f32[2,8,286], index: 6, kind: output, shape index: {0}]   ;;  %s1135_s7 = inlined_call_operand.vmem [shape: f32[2,8,1], index: 7, kind: output, shape index: {1}]   ;;  %s1136_s8 = inlined_call_operand.vmem [shape: f32[2,8,1], index: 8, kind: output, shape index: {2}]  }
   0x1 LB: > { %s885_s28 = sadd.s32 4294967295, %s968_s27   ;;  %p889_p0 = scmp.ge.s32.totalorder %s968_s27, 1  ;;  %s968_s27 = sphi %s1028_s27, %s19_s27  }
   0x2   : > { %p267_p1 = scmp.lt.s32.totalorder %s968_s27, 3 }
   0x4   : > { %p268_p2 = pnand %p889_p0, %p267_p1 }
   0x5   : > { %v329_v0 = vld [vmem:[%s1129_s1] sm:$0xf] (!%p268_p2)  ;;  %v970_v1 = vmov (!%p268_p2), 0   ;;  %p309_p3 = scmp.lt.s32.totalorder (!%p268_p2), %s885_s28, 1  ;;  %v971_v3 = vmov (!%p268_p2), 839922192   ;;  %v337_v5 = vlaneseq (!%p268_p2) }
   0x6   : > { %271 = sbr.rel (%p268_p2) target bundleno = 689 (0x2b1), region = 44  ;;  %957 = vset.pattern.permute.xlu0 (!%p268_p2), %v970_v1  ;;  %v344_v2 = vld [vmem:[%s1130_s2] sm:$0xf] (!%p268_p2)  ;;  %v335_v4 = vunpack.c.l.s4 (!%p268_p2), %v971_v3  ;;  %vm381_vm0 = vcmask (!%p268_p2), 551936   ;;  %s972_s17 = smov (!%p268_p2), 110   ;;  %vm390_vm1 = vcmask (!%p268_p2), 240640  }
   0x7   : > { %332 = vperm.xlu0 (!%p268_p2), %957, %v329_v0   ;;  %v1044_v7 = vshrl.u32 (!%p268_p2), %v337_v5, 7  ;;  %v361_v12 = vld [vmem:[%s1132_s4] sm:$0x7] (!%p268_p2)  ;;  %s973_s18 = smov (!%p268_p2), 127   ;;  %s974_s19 = smov (!%p268_p2), 109   ;;  %v979_v40 = vmov (!%p268_p2), 0.0|0.0  }
   0x8   : > { %v336_v6 = vunpack.c.0.s8 (!%p268_p2), %v335_v4  ;;  %s975_s20 = smov (!%p268_p2), 126   ;;  %s976_s21 = smov (!%p268_p2), 92   ;;  %928 = vmatprep.subr.bf16.mxu1 (!%p268_p2), %v979_v40  ;;  %v980_v42 = vmov (!%p268_p2), 0.0   ;;  %vm982_vm2 = vmmov (!%p268_p2), 0   ;;  %vm425_vm3 = vcmask (!%p268_p2), 1031168  }
   0x9   : > { %v365_v9 = vsub.s32 (!%p268_p2), 0, %v1044_v7  ;;  %v369_v10 = vsub.s32 (!%p268_p2), 1, %v1044_v7  ;;  %v373_v18 = vsub.s32 (!%p268_p2), 2, %v1044_v7  ;;  %s977_s22 = smov (!%p268_p2), 108   ;;  %s978_s23 = smov (!%p268_p2), 91   ;;  %651 = vmatprep.mubr.f32.mxu0 (!%p268_p2), %v980_v42  ;;  %917 = vmatprep.mubr.msk.f32.mxu1 (!%p268_p2), %vm982_vm2, %v980_v42  ;;  %vm404_vm4 = vcmask (!%p268_p2), 1039360  }
   0xa   : > { %v339_v8 = vsub.s32 (!%p268_p2), %v336_v6, %v1044_v7  ;;  %s981_s24 = smov (!%p268_p2), 90   ;;  %vm446_vm5 = vcmask (!%p268_p2), 900096   ;;  %vm412_vm6 = vcmask (!%p268_p2), 244740   ;;  %vm487_vm7 = vcmask (!%p268_p2), 883712  }
   0xb   : > { %347 = vperm.xlu0 (!%p268_p2), %957, %v344_v2   ;;  %v366_v16 = vrot.slane (!%p268_p2), %v361_v12, %v365_v9  ;;  %v370_v17 = vrot.slane (!%p268_p2), %v361_v12, %v369_v10  ;;  %v374_v23 = vrot.slane (!%p268_p2), %v361_v12, %v373_v18  ;;  %vm528_vm8 = vcmask (!%p268_p2), 744448  }
   0xc   : > { %vm466_vm9 = vcmask (!%p268_p2), 891904   ;;  %vm507_vm10 = vcmask (!%p268_p2), 752640   ;;  %vm548_vm11 = vcmask (!%p268_p2), 736256   ;;  %vm577_vm12 = vcmask (!%p268_p2), 1043456  }
   0xd   : > { %s1138_s28 = smov (!%p309_p3, %s885_s28), 1  ;;  %v376_v24 = vcombine.low %v366_v16, %v370_v17  ;;  %vm573_vm13 = vcmask 293888   ;;  %vm749_vm14 = vcmask 244736   ;;  %vm754_vm15 = vcmask 7168  }
   0xe   : > { %s934_s11 = smul.u32 12, %s1138_s28  ;;  %s892_s13 = sshll.u32 %s1138_s28, 3 }
   0xf   : > { %s935_s29 = smul.u32 24, %s1138_s28  ;;  %s322_s16 = scalar_lea.vmem %s1135_s7, %s892_s13 }
  0x10   : > { %s313_s14 = scalar_lea.vmem %s1128_s0, %s934_s11 }
  0x11   : > { %v327_v14 = vld [vmem:[%s313_s14] sm:$0xff]  ;;  %v328_v15 = vld [vmem:[%s313_s14 + $0x8] sm:$0xf]  ;;  %s318_s12 = scalar_lea.vmem %s1134_s6, %s935_s29 }
  0x86   : > { %v333_v11 = vpop.permute.xlu0 %332 }
  0x87   : > { %v340_v13 = vrot.slane %v333_v11, %v339_v8 }
  0x89   : > { %v342_v20 = vmul.f32 %v340_v13, %v327_v14  ;;  %v343_v21 = vmul.f32 %v340_v13, %v328_v15 }
  0x8a   : > { %v348_v19 = vpop.permute.xlu0 %347 }
  0x8b   : > { %v355_v22 = vrot.slane %v348_v19, %v339_v8 }
  0x8d   : > { %v357_v25 = vadd.f32 %v355_v22, %v342_v20  ;;  %v358_v26 = vadd.f32 %v355_v22, %v343_v21 }
  0x8f   : > { %v359_v27 = vmax.f32 %v357_v25, 0.0  ;;  %v360_v28 = vmax.f32 %v358_v26, 0.0 }
  0x91   : > { %v378_v29 = vmul.f32 %v376_v24, %v359_v27  ;;  %v379_v30 = vmul.f32 %v374_v23, %v360_v28 }
  0x93   : > { %382 = vst.msk [vmem:[#allocation2 + $0x8] sm:$0xf] %vm381_vm0, %v379_v30  ;;  %442 = vrot.lane.b32.xlu0 %v378_v29, %s972_s17  ;;  %400 = vrot.lane.b32.xlu1 %v378_v29, %s973_s18  ;;  %v418_v31 = vcombine.high %v378_v29, %v378_v29  ;;  %388 = vst [vmem:[#allocation3] sm:$0xf] %v378_v29  ;;  %v438_v36 = vcombine.low %v378_v29, %v378_v29 }
  0x95   : > { %389 = vst [vmem:[#allocation3 + $0x8] sm:$0xf] %v418_v31 }
  0x9a   : > { %v456_v32 = vld [vmem:[#allocation2 + $0x8] sm:$0xf] }
  0x9b   : > { %v415_v33 = vld [vmem:[#allocation2 + $0x8] sm:$0xf]  ;;  %464 = vrot.lane.b32.xlu0 %v456_v32, %s974_s19 }
  0x9c   : > { %423 = vrot.lane.b32.xlu1 %v415_v33, %s975_s20  ;;  %v497_v34 = vld [vmem:[#allocation2 + $0x8] sm:$0xf] }
  0x9d   : > { %v384_v35 = vld [vmem:[#allocation2 + $0x8] sm:$0xf] }
  0x9e   : > { %391 = vst.msk [vmem:[#allocation3 + $0x10] sm:$0xf] %vm390_vm1, %v384_v35  ;;  %v958_v37 = vld [vmem:[#allocation2 + $0x8] ss:$0 sps:$4 sm:$0xff]  }
  0x9f   : > { %505 = vrot.lane.b32.xlu0 %v497_v34, %s976_s21  ;;  %v959_v38 = vld [vmem:[#allocation2 + $0x8] ss:$0 sps:$4 sm:$0xff]  }
  0xa0   : > { %419 = vrot.lane.b32.xlu1 %v378_v29, %s975_s20  ;;  %v960_v39 = vld [vmem:[#allocation2 + $0x8] ss:$0 sps:$4 sm:$0xff]  }
  0xa1   : > { %v961_v41 = vld [vmem:[#allocation2 + $0x8] ss:$0 sps:$4 sm:$0xff]  }
  0xa2   : > { %v538_v43 = vld [vmem:[#allocation2 + $0x8] sm:$0xf] }
  0xa3   : > { %421 = vrot.lane.b32.xlu0 %v418_v31, %s975_s20 }
  0xa4   : > { %483 = vrot.lane.b32.xlu1 %v378_v29, %s977_s22 }
  0xa7   : > { %398 = vrot.lane.b32.xlu0 %v438_v36, %s973_s18 }
  0xa8   : > { %524 = vrot.lane.b32.xlu1 %v378_v29, %s978_s23 }
  0xab   : > { %440 = vrot.lane.b32.xlu0 %v438_v36, %s972_s17 }
  0xac   : > { %460 = vrot.lane.b32.xlu1 %v378_v29, %s974_s19 }
  0xaf   : > { %485 = vrot.lane.b32.xlu0 %v958_v37, %s977_s22 }
  0xb0   : > { %501 = vrot.lane.b32.xlu1 %v378_v29, %s976_s21 }
  0xb3   : > { %526 = vrot.lane.b32.xlu0 %v960_v39, %s978_s23 }
  0xb4   : > { %402 = vrot.lane.b32.xlu1 %v959_v38, %s973_s18 }
  0xb7   : > { %481 = vrot.lane.b32.xlu0 %v438_v36, %s977_s22 }
  0xb8   : > { %444 = vrot.lane.b32.xlu1 %v961_v41, %s972_s17 }
  0xbb   : > { %522 = vrot.lane.b32.xlu0 %v438_v36, %s978_s23  ;;  %v557_v36 = vld [vmem:[%s1131_s3] sm:$0xff] }
  0xbc   : > { %462 = vrot.lane.b32.xlu1 %v418_v31, %s974_s19  ;;  %s326_s19 = scalar_lea.vmem %s1136_s8, %s892_s13 }
  0xbf   : > { %546 = vrot.lane.b32.xlu0 %v538_v43, %s981_s24 }
  0xc0   : > { %503 = vrot.lane.b32.xlu1 %v418_v31, %s976_s21 }
  0xc4   : > { %544 = vrot.lane.b32.xlu1 %v418_v31, %s981_s24 }
  0xc8   : > { %542 = vrot.lane.b32.xlu1 %v378_v29, %s981_s24 }
 0x105   : > { %v443_v44 = vpop.permute.xlu0 %442  ;;  %v401_v45 = vpop.permute.xlu1 %400 }
 0x10d   : > { %v465_v46 = vpop.permute.xlu0 %464 }
 0x10e   : > { %v424_v47 = vpop.permute.xlu1 %423  ;;  %474 = vst.msk [vmem:[#allocation3 + $0x40] sm:$0xf] %vm390_vm1, %v465_v46 }
 0x10f   : > { %433 = vst.msk [vmem:[#allocation3 + $0x28] sm:$0xf] %vm390_vm1, %v424_v47 }
 0x111   : > { %v506_v48 = vpop.permute.xlu0 %505 }
 0x112   : > { %v420_v49 = vpop.permute.xlu1 %419  ;;  %515 = vst.msk [vmem:[#allocation3 + $0x58] sm:$0xf] %vm390_vm1, %v506_v48 }
 0x115   : > { %v422_v50 = vpop.permute.xlu0 %421 }
 0x116   : > { %v484_v51 = vpop.permute.xlu1 %483  ;;  %v426_v52 = vsel %vm425_vm3, %v420_v49, %v422_v50  ;;  %v427_v53 = vsel %vm425_vm3, %v422_v50, %v424_v47 }
 0x117   : > { %431 = vst [vmem:[#allocation3 + $0x18] sm:$0xf] %v426_v52  ;;  %432 = vst [vmem:[#allocation3 + $0x20] sm:$0xf] %v427_v53 }
 0x119   : > { %v399_v55 = vpop.permute.xlu0 %398 }
 0x11a   : > { %v525_v54 = vpop.permute.xlu1 %524  ;;  %v405_v56 = vsel %vm404_vm4, %v399_v55, %v401_v45 }
 0x11b   : > { %410 = vst [vmem:[#allocation3] sm:$0xf0] %v405_v56 }
 0x11d   : > { %v441_v58 = vpop.permute.xlu0 %440 }
 0x11e   : > { %v461_v57 = vpop.permute.xlu1 %460  ;;  %v447_v59 = vsel %vm446_vm5, %v441_v58, %v443_v44 }
 0x11f   : > { %452 = vst [vmem:[#allocation3 + $0x18] sm:$0xf0] %v447_v59 }
 0x121   : > { %v486_v61 = vpop.permute.xlu0 %485 }
 0x122   : > { %v502_v60 = vpop.permute.xlu1 %501  ;;  %v489_v62 = vsel %vm487_vm7, %v484_v51, %v486_v61  ;;  %495 = vst.msk [vmem:[#allocation3 + $0x40] sm:$0xf0] %vm412_vm6, %v486_v61  ;;  %v558_v27 = vld [vmem:[#allocation3] sm:$0xff] }
 0x123   : > { %494 = vst [vmem:[#allocation3 + $0x38] sm:$0xf0] %v489_v62 }
 0x125   : > { %v527_v0 = vpop.permute.xlu0 %526 }
 0x126   : > { %v403_v63 = vpop.permute.xlu1 %402  ;;  %v530_v2 = vsel %vm528_vm8, %v525_v54, %v527_v0  ;;  %536 = vst.msk [vmem:[#allocation3 + $0x58] sm:$0xf0] %vm412_vm6, %v527_v0  ;;  %v561_v20 = vld [vmem:[#allocation3 + $0x18] sm:$0xff] }
 0x127   : > { %v406_v1 = vsel %vm404_vm4, %v401_v45, %v403_v63  ;;  %413 = vst.msk [vmem:[#allocation3 + $0x10] sm:$0xf0] %vm412_vm6, %v403_v63  ;;  %535 = vst [vmem:[#allocation3 + $0x50] sm:$0xf0] %v530_v2  ;;  %v922_v29 = vpack.c.bf16 %v561_v20, %v558_v27 }
 0x128   : > { %411 = vst [vmem:[#allocation3 + $0x8] sm:$0xf0] %v406_v1 }
 0x129   : > { %v482_v4 = vpop.permute.xlu0 %481  ;;  %v566_v31 = vld [vmem:[#allocation3 + $0x40] sm:$0xff] }
 0x12a   : > { %v445_v3 = vpop.permute.xlu1 %444  ;;  %v488_v6 = vsel %vm487_vm7, %v482_v4, %v484_v51 }
 0x12b   : > { %v448_v5 = vsel %vm446_vm5, %v443_v44, %v445_v3  ;;  %454 = vst.msk [vmem:[#allocation3 + $0x28] sm:$0xf0] %vm412_vm6, %v445_v3  ;;  %493 = vst [vmem:[#allocation3 + $0x30] sm:$0xf0] %v488_v6 }
 0x12c   : > { %453 = vst [vmem:[#allocation3 + $0x20] sm:$0xf0] %v448_v5 }
 0x12d   : > { %v523_v11 = vpop.permute.xlu0 %522  ;;  %v569_v28 = vld [vmem:[#allocation3 + $0x58] sm:$0xff] }
 0x12e   : > { %v463_v8 = vpop.permute.xlu1 %462  ;;  %v529_v14 = vsel %vm528_vm8, %v523_v11, %v525_v54  ;;  %v560_v17 = vld [vmem:[#allocation3 + $0x10] sm:$0xff]  ;;  %v932_v33 = vpack.c.bf16 %v569_v28, %v566_v31 }
 0x12f   : > { %v467_v12 = vsel %vm466_vm9, %v461_v57, %v463_v8  ;;  %v468_v13 = vsel %vm466_vm9, %v463_v8, %v465_v46  ;;  %534 = vst [vmem:[#allocation3 + $0x48] sm:$0xf0] %v529_v14  ;;  %v559_v24 = vld [vmem:[#allocation3 + $0x8] sm:$0xff]  ;;  %v728_v46 = vld [vmem:[%s1133_s5] sm:$0x7] }
 0x130   : > { %472 = vst [vmem:[#allocation3 + $0x30] sm:$0xf] %v467_v12  ;;  %473 = vst [vmem:[#allocation3 + $0x38] sm:$0xf] %v468_v13  ;;  %v741_v49 = vrot.slane %v728_v46, %v373_v18  ;;  %v733_v50 = vrot.slane %v728_v46, %v365_v9  ;;  %v737_v51 = vrot.slane %v728_v46, %v369_v10 }
 0x131   : > { %v547_v16 = vpop.permute.xlu0 %546 }
 0x132   : > { %v504_v15 = vpop.permute.xlu1 %503  ;;  %v563_v19 = vld [vmem:[#allocation3 + $0x28] sm:$0xff]  ;;  %556 = vst.msk [vmem:[#allocation3 + $0x70] sm:$0xf] %vm390_vm1, %v547_v16 }
 0x133   : > { %v508_v21 = vsel %vm507_vm10, %v502_v60, %v504_v15  ;;  %v509_v22 = vsel %vm507_vm10, %v504_v15, %v506_v48  ;;  %v929_v23 = vpack.c.bf16 %v563_v19, %v560_v17  ;;  %v562_v25 = vld [vmem:[#allocation3 + $0x20] sm:$0xff] }
 0x134   : > { %513 = vst [vmem:[#allocation3 + $0x48] sm:$0xf] %v508_v21  ;;  %514 = vst [vmem:[#allocation3 + $0x50] sm:$0xf] %v509_v22  ;;  %v920_v26 = vpack.c.bf16 %v562_v25, %v559_v24 }
 0x135   : > { %930 = vmatpush3.bf16.msra.mxu1 %v929_v23 }
 0x136   : > { %v545_v30 = vpop.permute.xlu1 %544  ;;  %921 = vmatprep.subr.bf16.mxu0 %v920_v26  ;;  %931 = vmatprep.subr.bf16.mxu1 %v979_v40 }
 0x137   : > { %v550_v32 = vsel %vm548_vm11, %v545_v30, %v547_v16  ;;  %923 = vmatpush1.bf16.msra.mxu0 %v922_v29  ;;  %v565_v35 = vld [vmem:[#allocation3 + $0x38] sm:$0xff]  ;;  %v564_v39 = vld [vmem:[#allocation3 + $0x30] sm:$0xff] }
 0x138   : > { %555 = vst [vmem:[#allocation3 + $0x68] sm:$0xf] %v550_v32 }
 0x139   : > { %933 = vmatpush3.bf16.msra.mxu1 %v932_v33  ;;  %v572_v41 = vld [vmem:[#allocation3 + $0x70] sm:$0xf] }
 0x13a   : > { %v543_v34 = vpop.permute.xlu1 %542  ;;  %915 = vmatprep.subr.mxu1 %v980_v42 }
 0x13b   : > { %v549_v37 = vsel %vm548_vm11, %v543_v34, %v545_v30  ;;  %v568_v38 = vld [vmem:[#allocation3 + $0x50] sm:$0xff]  ;;  %v567_v40 = vld [vmem:[#allocation3 + $0x48] sm:$0xff] }
 0x13c   : > { %554 = vst [vmem:[#allocation3 + $0x60] sm:$0xf] %v549_v37  ;;  %v924_v43 = vpack.c.bf16 %v568_v38, %v565_v35  ;;  %v926_v44 = vpack.c.bf16 %v567_v40, %v564_v39 }
 0x13d   : > { %916 = vmatpush3.msk.msra.mxu1 %vm577_vm12, %v572_v41 }
 0x13e   : > { %925 = vmatprep.subr.bf16.mxu0 %v924_v43  ;;  %918 = vmatmul.mubr.msk.f32.vlgmr.msra.gmra.mrb[0].mxu1 %vm573_vm13, %v557_v36 }
 0x13f   : > { %927 = vmatpush1.bf16.msra.mxu0 %v926_v44  ;;  %v571_v42 = vld [vmem:[#allocation3 + $0x68] sm:$0xf] }
 0x140   : > { %894 = vmatprep.subr.msk.mxu0 %vm577_vm12, %v571_v42 }
 0x143   : > { %v570_v45 = vld [vmem:[#allocation3 + $0x60] sm:$0xf] }
 0x144   : > { %895 = vmatpush1.msk.msra.mxu0 %vm577_vm12, %v570_v45 }
 0x145   : > { %896 = vmatmul.mubr.msk.f32.vlgmr.msra.gmra.mrb[0].mxu0 %vm573_vm13, %v557_v36 }
 0x211   : > { %v724_v47 = vpop.f32.mrb[0].mxu1 }
 0x212   : > { %767 = vst.msk [vmem:[%s318_s12 + $0x10] sm:$0xff] %vm749_vm14, %v724_v47  ;;  %v919_v48 = vpop.f32.mrb[1].mxu1  ;;  %v747_v52 = vmul.f32 %v741_v49, %v724_v47 }
 0x214   : > { %v758_v58 = vmul.f32 %v747_v52, %v724_v47  ;;  %v750_v59 = vsel %vm749_vm14, %v747_v52, 0.0 }
 0x216   : > { %v760_v9 = vsel %vm749_vm14, %v758_v58, 0.0 }
 0x218   : > { %v653_v53 = vpop.f32.mrb[0].mxu0 }
 0x219   : > { %v745_v54 = vmul.f32 %v733_v50, %v653_v53  ;;  %765 = vst [vmem:[%s318_s12] sm:$0xff] %v653_v53  ;;  %v655_v55 = vpop.f32.mrb[1].mxu0 }
 0x21a   : > { %v746_v56 = vmul.f32 %v737_v51, %v655_v55  ;;  %766 = vst [vmem:[%s318_s12 + $0x8] sm:$0xff] %v655_v55 }
 0x21b   : > { %v756_v57 = vmul.f32 %v745_v54, %v653_v53 }
 0x21c   : > { %v757_v60 = vmul.f32 %v746_v56, %v655_v55  ;;  %v748_v18 = vadd.f32 %v746_v56, %v745_v54 }
 0x21e   : > { %v751_v61 = vadd.f32 %v750_v59, %v748_v18  ;;  %v759_v62 = vadd.f32 %v757_v60, %v756_v57 }
 0x220   : > { %752 = vadd.xlane.f32.xlu0 %v751_v61  ;;  %v761_v7 = vadd.f32 %v760_v9, %v759_v62 }
 0x222   : > { %762 = vadd.xlane.f32.xlu1 %v761_v7 }
 0x2ad   : > { %v753_v10 = vpop.xlane.xlu0 %752 }
 0x2ae   : > { %755 = vst.msk [vmem:[%s322_s16] sm:$0xff] %vm754_vm15, %v753_v10 }
 0x2af   : > { %v763_v63 = vpop.xlane.xlu1 %762 }
 0x2b0   : > { %764 = vst.msk [vmem:[%s326_s19] sm:$0xff] %vm754_vm15, %v763_v63 }
 0x2b1 PF: > { %s19_s27 = sadd.s32 1, %s968_s27  }
 0x2b2   : > { %p16_p4 = scmp.ge.s32.totalorder %s19_s27, 4  }
 0x2b4   :  { %18 = sbr.rel (!%p16_p4) target bundleno = 1 (0x1), region = 98 }

</bundles_post_ra>
